<compile_context>
chip_gen: v5e
topology: v5e:2x2
jax: 0.10.0
libtpu: 0.0.40
codegen_flags: <defaults>
</compile_context>

<pallas_src>
import jax
import jax.numpy as jnp
import numpy as np
from jax.experimental import pallas as pl
from jax.experimental.pallas import tpu as pltpu

_EPS = 1e-5
_MATMUL_DTYPE = jnp.bfloat16      # MXU operand dtype (f32 accumulation)
_VMEM_LIMIT = 48 * 1024 * 1024    # headroom vs v7x's 64 MiB physical VMEM
_MAX_TILE_ROWS = 512              # rows (of B*Ho*Wo) per grid step


def _round_up(x, m):
    return (x + m - 1) // m * m


def _flat_geometry(n, cout):
    """Shared padded flat layout: lane-dense channels, 16-aligned row tiles."""
    c_pad = _round_up(cout, 128)
    tile_n = min(_MAX_TILE_ROWS, _round_up(n, 16))
    n_pad = _round_up(n, tile_n)
    return n_pad, c_pad, tile_n


# ------------------------------ Pallas kernels --------------------------------
def _conv_stats_kernel(p_ref, w_ref, conv_ref, stats_ref):
    """Pass 1: one deep-K bf16 matmul (f32 accumulate) + per-tile sum/sumsq."""
    acc = jnp.dot(p_ref[...], w_ref[...], preferred_element_type=jnp.float32)
    conv_ref[...] = acc
    s = jnp.sum(acc, axis=0, keepdims=True)          # (1, C)
    ss = jnp.sum(acc * acc, axis=0, keepdims=True)   # (1, C)
    stats_ref[...] = jnp.concatenate([s, ss], axis=0)[None, :, :]


def _make_affine_kernel(res_mode, apply_relu):
    """Pass 2: y = conv*scale + shift [+ residual or residual-affine] [+ ReLU]."""
    def kernel(*refs):
        conv_ref, scale_ref, shift_ref = refs[0], refs[1], refs[2]
        y = conv_ref[...] * scale_ref[...] + shift_ref[...]
        if res_mode == "plain":
            y = y + refs[3][...]
            out_ref = refs[4]
        elif res_mode == "affine":
            # fused shortcut BN: res = conv_s * scale_s + shift_s
            y = y + refs[3][...] * refs[4][...] + refs[5][...]
            out_ref = refs[6]
        else:
            out_ref = refs[3]
        if apply_relu:
            y = jnp.maximum(y, 0.0)
        out_ref[...] = y.astype(out_ref.dtype)
    return kernel


# --------------------------- conv / BN building blocks ------------------------
def conv_pass1(x_nhwc, w_hwio, *, stride, pad):
    """Conv2d(bias=False) as a tiled deep-K matmul + per-tile BN statistics.

    Returns the raw conv output in a flat, channel-padded (n_pad, c_pad) f32
    layout, the per-tile (sum, sumsq) statistics, and the tiling metadata.
    """
    b, h, w, cin = x_nhwc.shape
    kh, kw, _, cout = w_hwio.shape
    hout = (h + 2 * pad - kh) // stride + 1
    wout = (w + 2 * pad - kw) // stride + 1
    n = b * hout * wout
    k_dim = kh * kw * cin
    k_pad = _round_up(k_dim, 128)
    n_pad, c_pad, tile_n = _flat_geometry(n, cout)
    num_tiles = n_pad // tile_n

    # Glue: im2col directly into the fused deep-K layout (bf16, lane-padded).
    # TODO(synk): build the kh*kw taps inside the kernel from a haloed NHWC
    # tile (pl.ds window slices) to remove the kh*kw-fold im2col HBM traffic.
    xp = jnp.pad(x_nhwc, ((0, 0), (pad, pad), (pad, pad), (0, 0))) if pad else x_nhwc
    taps = []
    for ky in range(kh):
        for kx in range(kw):
            sl = xp[:, ky: ky + (hout - 1) * stride + 1: stride,
                       kx: kx + (wout - 1) * stride + 1: stride, :]
            taps.append(sl.reshape(n, cin))
    patches = jnp.concatenate(taps, axis=1).astype(_MATMUL_DTYPE)     # (n, K)
    patches = jnp.pad(patches, ((0, n_pad - n), (0, k_pad - k_dim)))

    wmat = w_hwio.reshape(k_dim, cout).astype(_MATMUL_DTYPE)          # (K, Cout)
    wmat = jnp.pad(wmat, ((0, k_pad - k_dim), (0, c_pad - cout)))

    conv_flat, stats = pl.pallas_call(
        _conv_stats_kernel,
        grid=(num_tiles,),
        in_specs=[
            pl.BlockSpec((tile_n, k_pad), lambda i: (i, 0)),
            pl.BlockSpec((k_pad, c_pad), lambda i: (0, 0)),
        ],
        out_specs=[
            pl.BlockSpec((tile_n, c_pad), lambda i: (i, 0)),
            pl.BlockSpec((1, 2, c_pad), lambda i: (i, 0, 0)),
        ],
        out_shape=[
            jax.ShapeDtypeStruct((n_pad, c_pad), jnp.float32),
            jax.ShapeDtypeStruct((num_tiles, 2, c_pad), jnp.float32),
        ],
        compiler_params=pltpu.CompilerParams(
            dimension_semantics=("parallel",),
            vmem_limit_bytes=_VMEM_LIMIT),
    )(patches, wmat)

    meta = dict(b=b, hout=hout, wout=wout, cout=cout, n=n,
                n_pad=n_pad, c_pad=c_pad, tile_n=tile_n, num_tiles=num_tiles)
    return conv_flat, stats, meta


def bn_fold(stats, gamma, beta, meta, eps=_EPS):
    """Combine per-tile stats and fold BN(train) into per-channel scale/shift."""
    n, c_pad, cout = meta["n"], meta["c_pad"], meta["cout"]
    total = jnp.sum(stats, axis=0)                       # (2, c_pad)
    mean = total[0] / n
    var = jnp.maximum(total[1] / n - mean * mean, 0.0)   # biased (torch train)
    gamma_p = jnp.pad(gamma.astype(jnp.float32), (0, c_pad - cout))
    beta_p = jnp.pad(beta.astype(jnp.float32), (0, c_pad - cout))
    scale = gamma_p * jax.lax.rsqrt(var + eps)
    shift = beta_p - mean * scale
    return scale.reshape(1, c_pad), shift.reshape(1, c_pad)


def affine_pass2(conv_flat, scale2, shift2, meta, *, relu,
                 residual=None, out_dtype=jnp.float32):
    """Pass 2: normalize (+ residual) (+ ReLU), tiled & double-buffered.

    `residual` is None, ("plain", flat) for the identity shortcut, or
    ("affine", conv_flat_s, scale_s, shift_s) for a fused projection shortcut.
    """
    n_pad, c_pad = meta["n_pad"], meta["c_pad"]
    tile_n, num_tiles = meta["tile_n"], meta["num_tiles"]
    row_spec = pl.BlockSpec((tile_n, c_pad), lambda i: (i, 0))
    vec_spec = pl.BlockSpec((1, c_pad), lambda i: (0, 0))

    operands = [conv_flat, scale2, shift2]
    in_specs = [row_spec, vec_spec, vec_spec]
    if residual is None:
        res_mode = None
    elif residual[0] == "plain":
        res_mode = "plain"
        assert residual[1].shape == (n_pad, c_pad), residual[1].shape
        operands.append(residual[1])
        in_specs.append(row_spec)
    else:
        res_mode = "affine"
        assert residual[1].shape == (n_pad, c_pad), residual[1].shape
        operands.extend([residual[1], residual[2], residual[3]])
        in_specs.extend([row_spec, vec_spec, vec_spec])

    return pl.pallas_call(
        _make_affine_kernel(res_mode, relu),
        grid=(num_tiles,),
        in_specs=in_specs,
        out_specs=row_spec,
        out_shape=jax.ShapeDtypeStruct((n_pad, c_pad), out_dtype),
        compiler_params=pltpu.CompilerParams(
            dimension_semantics=("parallel",),
            vmem_limit_bytes=_VMEM_LIMIT),
    )(*operands)


def _flat_to_nhwc(flat, meta):
    b, hout, wout, cout, n = (meta["b"], meta["hout"], meta["wout"],
                              meta["cout"], meta["n"])
    return flat[:n, :cout].reshape(b, hout, wout, cout)


# ------------------------------- BasicBlock2D ---------------------------------
def basic_block_2d(x_nchw, params, stride):
    """Pallas implementation of BasicBlock2D.forward (NCHW in / NCHW out)."""
    x = jnp.transpose(x_nchw, (0, 2, 3, 1))               # NCHW -> NHWC

    # conv1 -> bn1 -> relu.  out1 only feeds conv2's bf16 im2col, so emit it
    # directly in bf16 (bit-identical values enter conv2, half the HBM bytes).
    c1_flat, c1_stats, m1 = conv_pass1(x, params["w1"], stride=stride, pad=1)
    s1, t1 = bn_fold(c1_stats, params["g1"], params["b1"], m1)
    out1_flat = affine_pass2(c1_flat, s1, t1, m1, relu=True,
                             out_dtype=_MATMUL_DTYPE)
    out1 = _flat_to_nhwc(out1_flat, m1)

    # conv2 pass 1 (+ BN2 stats).
    c2_flat, c2_stats, m2 = conv_pass1(out1, params["w2"], stride=1, pad=1)
    s2, t2 = bn_fold(c2_stats, params["g2"], params["b2"], m2)

    # shortcut branch.  Projection shortcut: only pass 1 runs here; its BN
    # affine is fused into conv2's pass-2 kernel below (no extra pallas_call,
    # no extra HBM round-trip of the shortcut tensor).
    if "ws" in params:
        cs_flat, cs_stats, ms = conv_pass1(x, params["ws"], stride=stride, pad=0)
        ss, ts = bn_fold(cs_stats, params["gs"], params["bs"], ms)
        assert (ms["n_pad"], ms["c_pad"], ms["tile_n"]) == \
               (m2["n_pad"], m2["c_pad"], m2["tile_n"])
        residual = ("affine", cs_flat, ss, ts)
    else:
        # identity shortcut: stride == 1 and cin == planes
        n2, n_pad2, c_pad2 = m2["n"], m2["n_pad"], m2["c_pad"]
        xf = x.reshape(n2, x.shape[-1]).astype(jnp.float32)
        res_flat = jnp.pad(xf, ((0, n_pad2 - n2), (0, c_pad2 - x.shape[-1])))
        residual = ("plain", res_flat)

    # conv2 -> bn2 -> (+ shortcut [BN fused]) -> relu
    out2_flat = affine_pass2(c2_flat, s2, t2, m2, relu=True,
                             residual=residual, out_dtype=jnp.float32)
    out2 = _flat_to_nhwc(out2_flat, m2)
    return jnp.transpose(out2, (0, 3, 1, 2))               # NHWC -> NCHW


# ------------------------------ params & reference ----------------------------
def init_params(key, in_planes, planes, stride):
    """Deterministic synthetic parameters (shapes match nn.Conv2d/BatchNorm2d)."""
    k1, k2, k3, k4 = jax.random.split(key, 4)

    def conv_w(k, kh, kw, cin, cout):
        bound = 1.0 / np.sqrt(kh * kw * cin)
        return jax.random.uniform(k, (kh, kw, cin, cout), jnp.float32,
                                  -bound, bound)

    def bn_params(k, c):
        kg, kb = jax.random.split(k)
        gamma = 1.0 + 0.1 * jax.random.normal(kg, (c,), jnp.float32)
        beta = 0.1 * jax.random.normal(kb, (c,), jnp.float32)
        return gamma, beta

    g1, b1 = bn_params(k1, planes)
    g2, b2 = bn_params(k2, planes)
    p = dict(
        w1=conv_w(k1, 3, 3, in_planes, planes), g1=g1, b1=b1,
        w2=conv_w(k2, 3, 3, planes, planes), g2=g2, b2=b2,
    )
    if stride != 1 or in_planes != planes:
        gs, bs = bn_params(k3, planes)
        p.update(ws=conv_w(k4, 1, 1, in_planes, planes), gs=gs, bs=bs)
    return p


def _block_ref(x_nhwc, params, stride, conv_dtype=jnp.float32):
    """Pure-JAX reference.  conv_dtype=bfloat16 mirrors the kernel's MXU dtype."""
    def conv(x, w, s, pad):
        return jax.lax.conv_general_dilated(
            x.astype(conv_dtype), w.astype(conv_dtype), (s, s),
            [(pad, pad), (pad, pad)],
            dimension_numbers=("NHWC", "HWIO", "NHWC"),
            preferred_element_type=jnp.float32)

    def bn(x, gamma, beta):
        mean = jnp.mean(x, axis=(0, 1, 2))
        var = jnp.var(x, axis=(0, 1, 2))   # biased: torch BN training forward
        return (x - mean) * jax.lax.rsqrt(var + _EPS) * gamma + beta

    out = jax.nn.relu(bn(conv(x_nhwc, params["w1"], stride, 1),
                         params["g1"], params["b1"]))
    out = bn(conv(out, params["w2"], 1, 1), params["g2"], params["b2"])
    if "ws" in params:
        sc = bn(conv(x_nhwc, params["ws"], stride, 0), params["gs"], params["bs"])
    else:
        sc = x_nhwc
    return jax.nn.relu(out + sc)


if __name__ == "__main__":
    key = jax.random.PRNGKey(0)
    kx, kp1, kp2 = jax.random.split(key, 3)

    x = jax.random.normal(kx, (2, 4, 16, 16), jnp.float32)   # PyTorch NCHW
    x_nhwc = jnp.transpose(x, (0, 2, 3, 1))

    fwd = jax.jit(basic_block_2d, static_argnums=(2,))

    def check(params, stride, out_shape):
        out = jax.block_until_ready(fwd(x, params, stride))
        assert out.shape == out_shape, out.shape
        # kernel-logic check: reference run at the kernel's matmul precision
        ref_bf16 = jnp.transpose(
            _block_ref(x_nhwc, params, stride, conv_dtype=_MATMUL_DTYPE),
            (0, 3, 1, 2))
        np.testing.assert_allclose(np.asarray(out), np.asarray(ref_bf16),
                                   rtol=1e-2, atol=1e-2)
        # fidelity check against the full-f32 PyTorch-style reference
        ref_f32 = jnp.transpose(_block_ref(x_nhwc, params, stride), (0, 3, 1, 2))
        np.testing.assert_allclose(np.asarray(out), np.asarray(ref_f32),
                                   rtol=5e-2, atol=5e-2)

    # Case 1: stride=1, in_planes == planes -> identity shortcut.
    check(init_params(kp1, 4, 4, 1), 1, (2, 4, 16, 16))
    # Case 2: stride=2, in_planes != planes -> 1x1 projection shortcut.
    check(init_params(kp2, 4, 8, 2), 2, (2, 8, 8, 8))

    print("KERNEL_OK")
</pallas_src>

<mosaic_0001>
module attributes {stable_mosaic.version = 11 : i64} {
  func.func @_conv_stats_kernel(%arg0: i32, %arg1: memref<512x128xbf16, #tpu.memory_space<vmem>>, %arg2: memref<128x128xbf16, #tpu.memory_space<vmem>>, %arg3: memref<512x128xf32, #tpu.memory_space<vmem>>, %arg4: memref<1x2x128xf32, #tpu.memory_space<vmem>>) attributes {dimension_semantics = [#tpu.dimension_semantics<parallel>], iteration_bounds = array<i64: 1>, scalar_prefetch = 0 : i64, scratch_operands = 0 : i64, tpu.core_type = #tpu.core_type<tc>, window_params = [{transform_indices = @transform_0, window_bounds = array<i64: 512, 128>}, {pipeline_mode = #tpu.pipeline_mode<synchronous>, transform_indices = @transform_1, window_bounds = array<i64: 128, 128>}, {transform_indices = @transform_2, window_bounds = array<i64: 512, 128>}, {transform_indices = @transform_3, window_bounds = array<i64: 1, 2, 128>}]} {
    %c0 = arith.constant 0 : index
    %c0_0 = arith.constant 0 : index
    %0 = vector.load %arg1[%c0, %c0_0] : memref<512x128xbf16, #tpu.memory_space<vmem>>, vector<512x128xbf16>
    %c0_1 = arith.constant 0 : index
    %c0_2 = arith.constant 0 : index
    %1 = vector.load %arg2[%c0_1, %c0_2] : memref<128x128xbf16, #tpu.memory_space<vmem>>, vector<128x128xbf16>
    %cst = arith.constant dense<0.000000e+00> : vector<512x128xf32>
    %2 = tpu.matmul %0, %1, %cst {dimension_numbers = #tpu.dot_dimension_numbers<[1], [0], [0], [1], [0, 0, 1, 1], [], []>} : vector<512x128xbf16>, vector<128x128xbf16>, vector<512x128xf32> -> vector<512x128xf32>
    %c0_3 = arith.constant 0 : index
    %c0_4 = arith.constant 0 : index
    %3 = vector.load %arg3[%c0_3, %c0_4] : memref<512x128xf32, #tpu.memory_space<vmem>>, vector<512x128xf32>
    tpu.vector_store %arg3[%c0_3, %c0_4], %2 {strides = array<i32>} : memref<512x128xf32, #tpu.memory_space<vmem>>, vector<512x128xf32>,
    %cst_5 = arith.constant dense<0.000000e+00> : vector<128xf32>
    %4 = vector.multi_reduction <add>, %2, %cst_5 [0] : vector<512x128xf32> to vector<128xf32>
    %5 = vector.shape_cast %4 : vector<128xf32> to vector<1x128xf32>
    %6 = arith.mulf %2, %2 : vector<512x128xf32>
    %cst_6 = arith.constant dense<0.000000e+00> : vector<128xf32>
    %7 = vector.multi_reduction <add>, %6, %cst_6 [0] : vector<512x128xf32> to vector<128xf32>
    %8 = vector.shape_cast %7 : vector<128xf32> to vector<1x128xf32>
    %9 = tpu.concatenate %5, %8 in 0 : vector<1x128xf32>, vector<1x128xf32> -> vector<2x128xf32>
    %10 = vector.shape_cast %9 : vector<2x128xf32> to vector<1x2x128xf32>
    %c0_7 = arith.constant 0 : index
    %c0_8 = arith.constant 0 : index
    %c0_9 = arith.constant 0 : index
    %11 = vector.load %arg4[%c0_7, %c0_8, %c0_9] : memref<1x2x128xf32, #tpu.memory_space<vmem>>, vector<1x2x128xf32>
    tpu.vector_store %arg4[%c0_7, %c0_8, %c0_9], %10 {strides = array<i32>} : memref<1x2x128xf32, #tpu.memory_space<vmem>>, vector<1x2x128xf32>,
    return
  }
  func.func @transform_0(%arg0: i32) -> (i32, i32) {
    %c0_i32 = arith.constant 0 : i32
    %c0_i32_0 = arith.constant 0 : i32
    return %arg0, %c0_i32 : i32, i32
  }
  func.func @transform_1(%arg0: i32) -> (i32, i32) {
    %c0_i32 = arith.constant 0 : i32
    %c0_i32_0 = arith.constant 0 : i32
    %c0_i32_1 = arith.constant 0 : i32
    return %c0_i32, %c0_i32_0 : i32, i32
  }
  func.func @transform_2(%arg0: i32) -> (i32, i32) {
    %c0_i32 = arith.constant 0 : i32
    %c0_i32_0 = arith.constant 0 : i32
    return %arg0, %c0_i32 : i32, i32
  }
  func.func @transform_3(%arg0: i32) -> (i32, i32, i32) {
    %c0_i32 = arith.constant 0 : i32
    %c0_i32_0 = arith.constant 0 : i32
    %c0_i32_1 = arith.constant 0 : i32
    return %arg0, %c0_i32, %c0_i32_0 : i32, i32, i32
  }
}

module attributes {stable_mosaic.version = 11 : i64} {
  func.func @kernel(%arg0: i32, %arg1: memref<512x128xf32, #tpu.memory_space<vmem>>, %arg2: memref<1x128xf32, #tpu.memory_space<vmem>>, %arg3: memref<1x128xf32, #tpu.memory_space<vmem>>, %arg4: memref<512x128xbf16, #tpu.memory_space<vmem>>) attributes {dimension_semantics = [#tpu.dimension_semantics<parallel>], iteration_bounds = array<i64: 1>, scalar_prefetch = 0 : i64, scratch_operands = 0 : i64, tpu.core_type = #tpu.core_type<tc>, window_params = [{transform_indices = @transform_0, window_bounds = array<i64: 512, 128>}, {pipeline_mode = #tpu.pipeline_mode<synchronous>, transform_indices = @transform_1, window_bounds = array<i64: 1, 128>}, {pipeline_mode = #tpu.pipeline_mode<synchronous>, transform_indices = @transform_2, window_bounds = array<i64: 1, 128>}, {transform_indices = @transform_3, window_bounds = array<i64: 512, 128>}]} {
    %c0 = arith.constant 0 : index
    %c0_0 = arith.constant 0 : index
    %0 = vector.load %arg1[%c0, %c0_0] : memref<512x128xf32, #tpu.memory_space<vmem>>, vector<512x128xf32>
    %c0_1 = arith.constant 0 : index
    %c0_2 = arith.constant 0 : index
    %1 = vector.load %arg2[%c0_1, %c0_2] : memref<1x128xf32, #tpu.memory_space<vmem>>, vector<1x128xf32>
    %2 = vector.broadcast %1 : vector<1x128xf32> to vector<512x128xf32>
    %3 = arith.mulf %0, %2 : vector<512x128xf32>
    %c0_3 = arith.constant 0 : index
    %c0_4 = arith.constant 0 : index
    %4 = vector.load %arg3[%c0_3, %c0_4] : memref<1x128xf32, #tpu.memory_space<vmem>>, vector<1x128xf32>
    %5 = vector.broadcast %4 : vector<1x128xf32> to vector<512x128xf32>
    %6 = arith.addf %3, %5 : vector<512x128xf32>
    %cst = arith.constant 0.000000e+00 : f32
    %7 = vector.broadcast %cst : f32 to vector<512x128xf32>
    %8 = arith.maximumf %6, %7 : vector<512x128xf32>
    %9 = arith.truncf %8 : vector<512x128xf32> to vector<512x128xbf16>
    %c0_5 = arith.constant 0 : index
    %c0_6 = arith.constant 0 : index
    %10 = vector.load %arg4[%c0_5, %c0_6] : memref<512x128xbf16, #tpu.memory_space<vmem>>, vector<512x128xbf16>
    tpu.vector_store %arg4[%c0_5, %c0_6], %9 {strides = array<i32>} : memref<512x128xbf16, #tpu.memory_space<vmem>>, vector<512x128xbf16>,
    return
  }
  func.func @transform_0(%arg0: i32) -> (i32, i32) {
    %c0_i32 = arith.constant 0 : i32
    %c0_i32_0 = arith.constant 0 : i32
    return %arg0, %c0_i32 : i32, i32
  }
  func.func @transform_1(%arg0: i32) -> (i32, i32) {
    %c0_i32 = arith.constant 0 : i32
    %c0_i32_0 = arith.constant 0 : i32
    %c0_i32_1 = arith.constant 0 : i32
    return %c0_i32, %c0_i32_0 : i32, i32
  }
  func.func @transform_2(%arg0: i32) -> (i32, i32) {
    %c0_i32 = arith.constant 0 : i32
    %c0_i32_0 = arith.constant 0 : i32
    %c0_i32_1 = arith.constant 0 : i32
    return %c0_i32, %c0_i32_0 : i32, i32
  }
  func.func @transform_3(%arg0: i32) -> (i32, i32) {
    %c0_i32 = arith.constant 0 : i32
    %c0_i32_0 = arith.constant 0 : i32
    return %arg0, %c0_i32 : i32, i32
  }
}

module attributes {stable_mosaic.version = 11 : i64} {
  func.func @kernel(%arg0: i32, %arg1: memref<512x128xf32, #tpu.memory_space<vmem>>, %arg2: memref<1x128xf32, #tpu.memory_space<vmem>>, %arg3: memref<1x128xf32, #tpu.memory_space<vmem>>, %arg4: memref<512x128xf32, #tpu.memory_space<vmem>>, %arg5: memref<512x128xf32, #tpu.memory_space<vmem>>) attributes {dimension_semantics = [#tpu.dimension_semantics<parallel>], iteration_bounds = array<i64: 1>, scalar_prefetch = 0 : i64, scratch_operands = 0 : i64, tpu.core_type = #tpu.core_type<tc>, window_params = [{transform_indices = @transform_0, window_bounds = array<i64: 512, 128>}, {pipeline_mode = #tpu.pipeline_mode<synchronous>, transform_indices = @transform_1, window_bounds = array<i64: 1, 128>}, {pipeline_mode = #tpu.pipeline_mode<synchronous>, transform_indices = @transform_2, window_bounds = array<i64: 1, 128>}, {transform_indices = @transform_3, window_bounds = array<i64: 512, 128>}, {transform_indices = @transform_4, window_bounds = array<i64: 512, 128>}]} {
    %c0 = arith.constant 0 : index
    %c0_0 = arith.constant 0 : index
    %0 = vector.load %arg1[%c0, %c0_0] : memref<512x128xf32, #tpu.memory_space<vmem>>, vector<512x128xf32>
    %c0_1 = arith.constant 0 : index
    %c0_2 = arith.constant 0 : index
    %1 = vector.load %arg2[%c0_1, %c0_2] : memref<1x128xf32, #tpu.memory_space<vmem>>, vector<1x128xf32>
    %2 = vector.broadcast %1 : vector<1x128xf32> to vector<512x128xf32>
    %3 = arith.mulf %0, %2 : vector<512x128xf32>
    %c0_3 = arith.constant 0 : index
    %c0_4 = arith.constant 0 : index
    %4 = vector.load %arg3[%c0_3, %c0_4] : memref<1x128xf32, #tpu.memory_space<vmem>>, vector<1x128xf32>
    %5 = vector.broadcast %4 : vector<1x128xf32> to vector<512x128xf32>
    %6 = arith.addf %3, %5 : vector<512x128xf32>
    %c0_5 = arith.constant 0 : index
    %c0_6 = arith.constant 0 : index
    %7 = vector.load %arg4[%c0_5, %c0_6] : memref<512x128xf32, #tpu.memory_space<vmem>>, vector<512x128xf32>
    %8 = arith.addf %6, %7 : vector<512x128xf32>
    %cst = arith.constant 0.000000e+00 : f32
    %9 = vector.broadcast %cst : f32 to vector<512x128xf32>
    %10 = arith.maximumf %8, %9 : vector<512x128xf32>
    %c0_7 = arith.constant 0 : index
    %c0_8 = arith.constant 0 : index
    %11 = vector.load %arg5[%c0_7, %c0_8] : memref<512x128xf32, #tpu.memory_space<vmem>>, vector<512x128xf32>
    tpu.vector_store %arg5[%c0_7, %c0_8], %10 {strides = array<i32>} : memref<512x128xf32, #tpu.memory_space<vmem>>, vector<512x128xf32>,
    return
  }
  func.func @transform_0(%arg0: i32) -> (i32, i32) {
    %c0_i32 = arith.constant 0 : i32
    %c0_i32_0 = arith.constant 0 : i32
    return %arg0, %c0_i32 : i32, i32
  }
  func.func @transform_1(%arg0: i32) -> (i32, i32) {
    %c0_i32 = arith.constant 0 : i32
    %c0_i32_0 = arith.constant 0 : i32
    %c0_i32_1 = arith.constant 0 : i32
    return %c0_i32, %c0_i32_0 : i32, i32
  }
  func.func @transform_2(%arg0: i32) -> (i32, i32) {
    %c0_i32 = arith.constant 0 : i32
    %c0_i32_0 = arith.constant 0 : i32
    %c0_i32_1 = arith.constant 0 : i32
    return %c0_i32, %c0_i32_0 : i32, i32
  }
  func.func @transform_3(%arg0: i32) -> (i32, i32) {
    %c0_i32 = arith.constant 0 : i32
    %c0_i32_0 = arith.constant 0 : i32
    return %arg0, %c0_i32 : i32, i32
  }
  func.func @transform_4(%arg0: i32) -> (i32, i32) {
    %c0_i32 = arith.constant 0 : i32
    %c0_i32_0 = arith.constant 0 : i32
    return %arg0, %c0_i32 : i32, i32
  }
}

</mosaic_0001>

<bundles_post_ra>
// kernel: basic_block_2d.5
= control target key start
LH: loop header
LB: loop body
LE: loop exit
PB: predicated region body
PF: predicated region fallthrough
CT: control target
= control target key end

     0   :  { %s1049_s0 = inlined_call_operand.vmem [shape: f32[512,128], index: 0, kind: input, shape index: {}]   ;;  %s1050_s1 = inlined_call_operand.vmem [shape: f32[1,128], index: 1, kind: input, shape index: {}]   ;;  %s1051_s2 = inlined_call_operand.vmem [shape: f32[1,128], index: 2, kind: input, shape index: {}]   ;;  %s1052_s3 = inlined_call_operand.vmem [shape: bf16[512,128], index: 3, kind: output, shape index: {}]  }
   0x1   :  { %v14_v0 = vld [vmem:[%s1049_s0] sm:$0xff]  ;;  %v15_v1 = vld [vmem:[%s1049_s0 + $0x8] sm:$0xff]  ;;  %v16_v4 = vld [vmem:[%s1049_s0 + $0x10] sm:$0xff] }
   0x2   :  { %v632_v2 = vld [vmem:[%s1050_s1] ss:$0 sm:$0xff]  ;;  %v17_v5 = vld [vmem:[%s1049_s0 + $0x18] sm:$0xff]  ;;  %v19_v11 = vld [vmem:[%s1049_s0 + $0x28] sm:$0xff] }
   0x3   :  { %v637_v3 = vld [vmem:[%s1051_s2] ss:$0 sm:$0xff]  ;;  %v82_v7 = vmul.f32 %v632_v2, %v14_v0  ;;  %v83_v8 = vmul.f32 %v632_v2, %v15_v1  ;;  %v84_v9 = vmul.f32 %v632_v2, %v16_v4  ;;  %v85_v10 = vmul.f32 %v632_v2, %v17_v5  ;;  %v20_v12 = vld [vmem:[%s1049_s0 + $0x30] sm:$0xff]  ;;  %v21_v13 = vld [vmem:[%s1049_s0 + $0x38] sm:$0xff] }
   0x4   :  { %v18_v6 = vld [vmem:[%s1049_s0 + $0x20] sm:$0xff]  ;;  %v87_v15 = vmul.f32 %v632_v2, %v19_v11  ;;  %v88_v16 = vmul.f32 %v632_v2, %v20_v12  ;;  %v89_v17 = vmul.f32 %v632_v2, %v21_v13  ;;  %v23_v27 = vld [vmem:[%s1049_s0 + $0x48] sm:$0xff]  ;;  %v24_v32 = vld [vmem:[%s1049_s0 + $0x50] sm:$0xff] }
   0x5   :  { %v86_v14 = vmul.f32 %v632_v2, %v18_v6  ;;  %v150_v18 = vadd.f32 %v637_v3, %v82_v7  ;;  %v151_v19 = vadd.f32 %v637_v3, %v83_v8  ;;  %v152_v20 = vadd.f32 %v637_v3, %v84_v9  ;;  %v22_v26 = vld [vmem:[%s1049_s0 + $0x40] sm:$0xff]  ;;  %v25_v33 = vld [vmem:[%s1049_s0 + $0x58] sm:$0xff]  ;;  %v27_v39 = vld [vmem:[%s1049_s0 + $0x68] sm:$0xff] }
   0x6   :  { %v153_v21 = vadd.f32 %v637_v3, %v85_v10  ;;  %v155_v23 = vadd.f32 %v637_v3, %v87_v15  ;;  %v156_v24 = vadd.f32 %v637_v3, %v88_v16  ;;  %v157_v25 = vadd.f32 %v637_v3, %v89_v17  ;;  %v26_v38 = vld [vmem:[%s1049_s0 + $0x60] sm:$0xff]  ;;  %v28_v44 = vld [vmem:[%s1049_s0 + $0x70] sm:$0xff]  ;;  %v29_v45 = vld [vmem:[%s1049_s0 + $0x78] sm:$0xff] }
   0x7   :  { %v154_v22 = vadd.f32 %v637_v3, %v86_v14  ;;  %v214_v28 = vmax.f32 %v150_v18, 0.0  ;;  %v215_v29 = vmax.f32 %v151_v19, 0.0  ;;  %v216_v30 = vmax.f32 %v152_v20, 0.0  ;;  %v30_v58 = vld [vmem:[%s1049_s0 + $0x80] sm:$0xff]  ;;  %v31_v63 = vld [vmem:[%s1049_s0 + $0x88] sm:$0xff]  ;;  %v32_v6 = vld [vmem:[%s1049_s0 + $0x90] sm:$0xff] }
   0x8   :  { %v217_v31 = vmax.f32 %v153_v21, 0.0  ;;  %v219_v35 = vmax.f32 %v155_v23, 0.0  ;;  %v220_v36 = vmax.f32 %v156_v24, 0.0  ;;  %v221_v37 = vmax.f32 %v157_v25, 0.0  ;;  %v33_v7 = vld [vmem:[%s1049_s0 + $0x98] sm:$0xff]  ;;  %v34_v12 = vld [vmem:[%s1049_s0 + $0xa0] sm:$0xff] }
   0x9   :  { %v218_v34 = vmax.f32 %v154_v22, 0.0  ;;  %v413_v40 = vpack.c.bf16 %v215_v29, %v214_v28  ;;  %v90_v42 = vmul.f32 %v632_v2, %v22_v26  ;;  %v91_v43 = vmul.f32 %v632_v2, %v23_v27  ;;  %v35_v13 = vld [vmem:[%s1049_s0 + $0xa8] sm:$0xff]  ;;  %v36_v18 = vld [vmem:[%s1049_s0 + $0xb0] sm:$0xff]  ;;  %v37_v23 = vld [vmem:[%s1049_s0 + $0xb8] sm:$0xff] }
   0xa   :  { %v418_v41 = vpack.c.bf16 %v217_v31, %v216_v30  ;;  %v428_v47 = vpack.c.bf16 %v221_v37, %v220_v36  ;;  %v92_v48 = vmul.f32 %v632_v2, %v24_v32  ;;  %v93_v49 = vmul.f32 %v632_v2, %v25_v33  ;;  %v38_v28 = vld [vmem:[%s1049_s0 + $0xc0] sm:$0xff]  ;;  %v39_v37 = vld [vmem:[%s1049_s0 + $0xc8] sm:$0xff] }
   0xb   :  { %v423_v46 = vpack.c.bf16 %v219_v35, %v218_v34  ;;  %414 = vst [vmem:[%s1052_s3] sm:$0xff] %v413_v40   ;;  %v158_v50 = vadd.f32 %v637_v3, %v90_v42  ;;  %v159_v51 = vadd.f32 %v637_v3, %v91_v43  ;;  %v94_v52 = vmul.f32 %v632_v2, %v26_v38  ;;  %v40_v42 = vld [vmem:[%s1049_s0 + $0xd0] sm:$0xff]  ;;  %v41_v43 = vld [vmem:[%s1049_s0 + $0xd8] sm:$0xff] }
   0xc   :  { %v95_v53 = vmul.f32 %v632_v2, %v27_v39  ;;  %570 = vst [vmem:[%s1052_s3 + $0x8] sm:$0xff] %v418_v41   ;;  %v160_v54 = vadd.f32 %v637_v3, %v92_v48  ;;  %v161_v55 = vadd.f32 %v637_v3, %v93_v49  ;;  %v96_v56 = vmul.f32 %v632_v2, %v28_v44  ;;  %v42_v48 = vld [vmem:[%s1049_s0 + $0xe0] sm:$0xff]  ;;  %v43_v49 = vld [vmem:[%s1049_s0 + $0xe8] sm:$0xff] }
   0xd   :  { %v97_v57 = vmul.f32 %v632_v2, %v29_v45  ;;  %571 = vst [vmem:[%s1052_s3 + $0x10] sm:$0xff] %v423_v46   ;;  %v222_v59 = vmax.f32 %v158_v50, 0.0  ;;  %v223_v60 = vmax.f32 %v159_v51, 0.0  ;;  %v162_v61 = vadd.f32 %v637_v3, %v94_v52 }
   0xe   :  { %v163_v62 = vadd.f32 %v637_v3, %v95_v53  ;;  %572 = vst [vmem:[%s1052_s3 + $0x18] sm:$0xff] %v428_v47   ;;  %v224_v0 = vmax.f32 %v160_v54, 0.0  ;;  %v225_v1 = vmax.f32 %v161_v55, 0.0  ;;  %v164_v4 = vadd.f32 %v637_v3, %v96_v56  ;;  %v44_v54 = vld [vmem:[%s1049_s0 + $0xf0] sm:$0xff] }
   0xf   :  { %v165_v5 = vadd.f32 %v637_v3, %v97_v57  ;;  %v433_v8 = vpack.c.bf16 %v223_v60, %v222_v59  ;;  %v226_v9 = vmax.f32 %v162_v61, 0.0  ;;  %v98_v11 = vmul.f32 %v632_v2, %v30_v58  ;;  %v45_v59 = vld [vmem:[%s1049_s0 + $0xf8] sm:$0xff] }
  0x10   :  { %v227_v10 = vmax.f32 %v163_v62, 0.0  ;;  %v438_v14 = vpack.c.bf16 %v225_v1, %v224_v0  ;;  %v228_v15 = vmax.f32 %v164_v4, 0.0  ;;  %v99_v17 = vmul.f32 %v632_v2, %v31_v63  ;;  %v46_v0 = vld [vmem:[%s1049_s0 + $0x100] sm:$0xff] }
  0x11   :  { %v229_v16 = vmax.f32 %v165_v5, 0.0  ;;  %573 = vst [vmem:[%s1052_s3 + $0x20] sm:$0xff] %v433_v8   ;;  %v166_v20 = vadd.f32 %v637_v3, %v98_v11  ;;  %v100_v21 = vmul.f32 %v632_v2, %v32_v6  ;;  %v101_v22 = vmul.f32 %v632_v2, %v33_v7  ;;  %v47_v11 = vld [vmem:[%s1049_s0 + $0x108] sm:$0xff] }
  0x12   :  { %v443_v19 = vpack.c.bf16 %v227_v10, %v226_v9  ;;  %574 = vst [vmem:[%s1052_s3 + $0x28] sm:$0xff] %v438_v14   ;;  %v167_v25 = vadd.f32 %v637_v3, %v99_v17  ;;  %v102_v26 = vmul.f32 %v632_v2, %v34_v12  ;;  %v103_v27 = vmul.f32 %v632_v2, %v35_v13  ;;  %v49_v17 = vld [vmem:[%s1049_s0 + $0x118] sm:$0xff] }
  0x13   :  { %v448_v24 = vpack.c.bf16 %v229_v16, %v228_v15  ;;  %v230_v29 = vmax.f32 %v166_v20, 0.0  ;;  %v168_v30 = vadd.f32 %v637_v3, %v100_v21  ;;  %v169_v31 = vadd.f32 %v637_v3, %v101_v22  ;;  %v48_v16 = vld [vmem:[%s1049_s0 + $0x110] sm:$0xff]  ;;  %v50_v22 = vld [vmem:[%s1049_s0 + $0x120] sm:$0xff] }
  0x14   :  { %575 = vst [vmem:[%s1052_s3 + $0x30] sm:$0xff] %v443_v19   ;;  %v104_v32 = vmul.f32 %v632_v2, %v36_v18  ;;  %v231_v33 = vmax.f32 %v167_v25, 0.0  ;;  %v170_v34 = vadd.f32 %v637_v3, %v102_v26  ;;  %v171_v35 = vadd.f32 %v637_v3, %v103_v27 }
  0x15   :  { %576 = vst [vmem:[%s1052_s3 + $0x38] sm:$0xff] %v448_v24   ;;  %v105_v36 = vmul.f32 %v632_v2, %v37_v23  ;;  %v232_v38 = vmax.f32 %v168_v30, 0.0  ;;  %v233_v39 = vmax.f32 %v169_v31, 0.0  ;;  %v106_v41 = vmul.f32 %v632_v2, %v38_v28  ;;  %v51_v23 = vld [vmem:[%s1049_s0 + $0x128] sm:$0xff]  ;;  %v52_v28 = vld [vmem:[%s1049_s0 + $0x130] sm:$0xff] }
  0x16   :  { %v172_v40 = vadd.f32 %v637_v3, %v104_v32  ;;  %v453_v44 = vpack.c.bf16 %v231_v33, %v230_v29  ;;  %v234_v45 = vmax.f32 %v170_v34, 0.0  ;;  %v235_v46 = vmax.f32 %v171_v35, 0.0  ;;  %v53_v33 = vld [vmem:[%s1049_s0 + $0x138] sm:$0xff] }
  0x17   :  { %v173_v47 = vadd.f32 %v637_v3, %v105_v36  ;;  %v458_v50 = vpack.c.bf16 %v233_v39, %v232_v38  ;;  %v107_v52 = vmul.f32 %v632_v2, %v39_v37  ;;  %v174_v53 = vadd.f32 %v637_v3, %v106_v41  ;;  %v54_v38 = vld [vmem:[%s1049_s0 + $0x140] sm:$0xff] }
  0x18   :  { %v236_v51 = vmax.f32 %v172_v40, 0.0  ;;  %577 = vst [vmem:[%s1052_s3 + $0x40] sm:$0xff] %v453_v44   ;;  %v463_v55 = vpack.c.bf16 %v235_v46, %v234_v45  ;;  %v108_v57 = vmul.f32 %v632_v2, %v40_v42  ;;  %v109_v58 = vmul.f32 %v632_v2, %v41_v43 }
  0x19   :  { %v237_v56 = vmax.f32 %v173_v47, 0.0  ;;  %578 = vst [vmem:[%s1052_s3 + $0x48] sm:$0xff] %v458_v50   ;;  %v175_v60 = vadd.f32 %v637_v3, %v107_v52  ;;  %v238_v61 = vmax.f32 %v174_v53, 0.0  ;;  %v110_v62 = vmul.f32 %v632_v2, %v42_v48  ;;  %v55_v47 = vld [vmem:[%s1049_s0 + $0x148] sm:$0xff]  ;;  %v56_v52 = vld [vmem:[%s1049_s0 + $0x150] sm:$0xff]  ;;  %v57_v53 = vld [vmem:[%s1049_s0 + $0x158] sm:$0xff] }
  0x1a   :  { %v111_v63 = vmul.f32 %v632_v2, %v43_v49  ;;  %579 = vst [vmem:[%s1052_s3 + $0x50] sm:$0xff] %v463_v55   ;;  %v176_v4 = vadd.f32 %v637_v3, %v108_v57  ;;  %v177_v5 = vadd.f32 %v637_v3, %v109_v58  ;;  %v112_v6 = vmul.f32 %v632_v2, %v44_v54  ;;  %v58_v58 = vld [vmem:[%s1049_s0 + $0x160] sm:$0xff] }
  0x1b   :  { %v468_v1 = vpack.c.bf16 %v237_v56, %v236_v51  ;;  %v239_v7 = vmax.f32 %v175_v60, 0.0  ;;  %v178_v8 = vadd.f32 %v637_v3, %v110_v62  ;;  %v113_v10 = vmul.f32 %v632_v2, %v45_v59  ;;  %v59_v59 = vld [vmem:[%s1049_s0 + $0x168] sm:$0xff] }
  0x1c   :  { %v179_v9 = vadd.f32 %v637_v3, %v111_v63  ;;  %v240_v12 = vmax.f32 %v176_v4, 0.0  ;;  %v241_v13 = vmax.f32 %v177_v5, 0.0  ;;  %v180_v14 = vadd.f32 %v637_v3, %v112_v6 }
  0x1d   :  { %580 = vst [vmem:[%s1052_s3 + $0x58] sm:$0xff] %v468_v1   ;;  %v114_v15 = vmul.f32 %v632_v2, %v46_v0  ;;  %v473_v18 = vpack.c.bf16 %v239_v7, %v238_v61  ;;  %v242_v19 = vmax.f32 %v178_v8, 0.0  ;;  %v181_v21 = vadd.f32 %v637_v3, %v113_v10  ;;  %v60_v0 = vld [vmem:[%s1049_s0 + $0x170] sm:$0xff]  ;;  %v61_v7 = vld [vmem:[%s1049_s0 + $0x178] sm:$0xff] }
  0x1e   :  { %v243_v20 = vmax.f32 %v179_v9, 0.0  ;;  %v478_v24 = vpack.c.bf16 %v241_v13, %v240_v12  ;;  %v244_v25 = vmax.f32 %v180_v14, 0.0  ;;  %v115_v26 = vmul.f32 %v632_v2, %v47_v11  ;;  %v62_v12 = vld [vmem:[%s1049_s0 + $0x180] sm:$0xff] }
  0x1f   :  { %v182_v27 = vadd.f32 %v637_v3, %v114_v15  ;;  %581 = vst [vmem:[%s1052_s3 + $0x60] sm:$0xff] %v473_v18   ;;  %v245_v30 = vmax.f32 %v181_v21, 0.0  ;;  %v116_v31 = vmul.f32 %v632_v2, %v48_v16  ;;  %v117_v32 = vmul.f32 %v632_v2, %v49_v17  ;;  %v63_v21 = vld [vmem:[%s1049_s0 + $0x188] sm:$0xff] }
  0x20   :  { %v483_v29 = vpack.c.bf16 %v243_v20, %v242_v19  ;;  %582 = vst [vmem:[%s1052_s3 + $0x68] sm:$0xff] %v478_v24   ;;  %v183_v34 = vadd.f32 %v637_v3, %v115_v26  ;;  %v118_v36 = vmul.f32 %v632_v2, %v50_v22  ;;  %v119_v37 = vmul.f32 %v632_v2, %v51_v23  ;;  %v64_v26 = vld [vmem:[%s1049_s0 + $0x190] sm:$0xff] }
  0x21   :  { %v246_v35 = vmax.f32 %v182_v27, 0.0  ;;  %v488_v39 = vpack.c.bf16 %v245_v30, %v244_v25  ;;  %v184_v40 = vadd.f32 %v637_v3, %v116_v31  ;;  %v185_v41 = vadd.f32 %v637_v3, %v117_v32  ;;  %v65_v27 = vld [vmem:[%s1049_s0 + $0x198] sm:$0xff]  ;;  %v66_v32 = vld [vmem:[%s1049_s0 + $0x1a0] sm:$0xff] }
  0x22   :  { %583 = vst [vmem:[%s1052_s3 + $0x70] sm:$0xff] %v483_v29   ;;  %v120_v42 = vmul.f32 %v632_v2, %v52_v28  ;;  %v247_v43 = vmax.f32 %v183_v34, 0.0  ;;  %v186_v44 = vadd.f32 %v637_v3, %v118_v36  ;;  %v187_v45 = vadd.f32 %v637_v3, %v119_v37 }
  0x23   :  { %v121_v46 = vmul.f32 %v632_v2, %v53_v33  ;;  %584 = vst [vmem:[%s1052_s3 + $0x78] sm:$0xff] %v488_v39   ;;  %v248_v48 = vmax.f32 %v184_v40, 0.0  ;;  %v249_v49 = vmax.f32 %v185_v41, 0.0  ;;  %v122_v51 = vmul.f32 %v632_v2, %v54_v38  ;;  %v67_v33 = vld [vmem:[%s1049_s0 + $0x1a8] sm:$0xff]  ;;  %v68_v38 = vld [vmem:[%s1049_s0 + $0x1b0] sm:$0xff] }
  0x24   :  { %v188_v50 = vadd.f32 %v637_v3, %v120_v42  ;;  %v493_v54 = vpack.c.bf16 %v247_v43, %v246_v35  ;;  %v250_v55 = vmax.f32 %v186_v44, 0.0  ;;  %v251_v56 = vmax.f32 %v187_v45, 0.0  ;;  %v69_v43 = vld [vmem:[%s1049_s0 + $0x1b8] sm:$0xff] }
  0x25   :  { %v189_v57 = vadd.f32 %v637_v3, %v121_v46  ;;  %v498_v60 = vpack.c.bf16 %v249_v49, %v248_v48  ;;  %v123_v62 = vmul.f32 %v632_v2, %v55_v47  ;;  %v190_v63 = vadd.f32 %v637_v3, %v122_v51  ;;  %v70_v48 = vld [vmem:[%s1049_s0 + $0x1c0] sm:$0xff] }
  0x26   :  { %v252_v61 = vmax.f32 %v188_v50, 0.0  ;;  %585 = vst [vmem:[%s1052_s3 + $0x80] sm:$0xff] %v493_v54   ;;  %v503_v1 = vpack.c.bf16 %v251_v56, %v250_v55  ;;  %v124_v5 = vmul.f32 %v632_v2, %v56_v52  ;;  %v125_v6 = vmul.f32 %v632_v2, %v57_v53 }
  0x27   :  { %v253_v4 = vmax.f32 %v189_v57, 0.0  ;;  %586 = vst [vmem:[%s1052_s3 + $0x88] sm:$0xff] %v498_v60   ;;  %v191_v8 = vadd.f32 %v637_v3, %v123_v62  ;;  %v254_v9 = vmax.f32 %v190_v63, 0.0  ;;  %v126_v10 = vmul.f32 %v632_v2, %v58_v58  ;;  %v71_v57 = vld [vmem:[%s1049_s0 + $0x1c8] sm:$0xff]  ;;  %v72_v62 = vld [vmem:[%s1049_s0 + $0x1d0] sm:$0xff]  ;;  %v73_v63 = vld [vmem:[%s1049_s0 + $0x1d8] sm:$0xff] }
  0x28   :  { %v127_v11 = vmul.f32 %v632_v2, %v59_v59  ;;  %587 = vst [vmem:[%s1052_s3 + $0x90] sm:$0xff] %v503_v1   ;;  %v192_v14 = vadd.f32 %v637_v3, %v124_v5  ;;  %v193_v15 = vadd.f32 %v637_v3, %v125_v6  ;;  %v128_v16 = vmul.f32 %v632_v2, %v60_v0  ;;  %v74_v6 = vld [vmem:[%s1049_s0 + $0x1e0] sm:$0xff] }
  0x29   :  { %v508_v13 = vpack.c.bf16 %v253_v4, %v252_v61  ;;  %v255_v17 = vmax.f32 %v191_v8, 0.0  ;;  %v194_v18 = vadd.f32 %v637_v3, %v126_v10  ;;  %v129_v20 = vmul.f32 %v632_v2, %v61_v7  ;;  %v75_v7 = vld [vmem:[%s1049_s0 + $0x1e8] sm:$0xff] }
  0x2a   :  { %v195_v19 = vadd.f32 %v637_v3, %v127_v11  ;;  %v256_v22 = vmax.f32 %v192_v14, 0.0  ;;  %v257_v23 = vmax.f32 %v193_v15, 0.0  ;;  %v196_v24 = vadd.f32 %v637_v3, %v128_v16 }
  0x2b   :  { %588 = vst [vmem:[%s1052_s3 + $0x98] sm:$0xff] %v508_v13   ;;  %v130_v25 = vmul.f32 %v632_v2, %v62_v12  ;;  %v513_v28 = vpack.c.bf16 %v255_v17, %v254_v9  ;;  %v258_v29 = vmax.f32 %v194_v18, 0.0  ;;  %v197_v31 = vadd.f32 %v637_v3, %v129_v20  ;;  %v76_v12 = vld [vmem:[%s1049_s0 + $0x1f0] sm:$0xff]  ;;  %v77_v17 = vld [vmem:[%s1049_s0 + $0x1f8] sm:$0xff] }
  0x2c   :  { %v259_v30 = vmax.f32 %v195_v19, 0.0  ;;  %v518_v34 = vpack.c.bf16 %v257_v23, %v256_v22  ;;  %v260_v35 = vmax.f32 %v196_v24, 0.0  ;;  %v131_v36 = vmul.f32 %v632_v2, %v63_v21 }
  0x2d   :  { %v198_v37 = vadd.f32 %v637_v3, %v130_v25  ;;  %589 = vst [vmem:[%s1052_s3 + $0xa0] sm:$0xff] %v513_v28   ;;  %v261_v40 = vmax.f32 %v197_v31, 0.0  ;;  %v132_v41 = vmul.f32 %v632_v2, %v64_v26  ;;  %v133_v42 = vmul.f32 %v632_v2, %v65_v27 }
  0x2e   :  { %v523_v39 = vpack.c.bf16 %v259_v30, %v258_v29  ;;  %590 = vst [vmem:[%s1052_s3 + $0xa8] sm:$0xff] %v518_v34   ;;  %v199_v44 = vadd.f32 %v637_v3, %v131_v36  ;;  %v134_v46 = vmul.f32 %v632_v2, %v66_v32  ;;  %v135_v47 = vmul.f32 %v632_v2, %v67_v33 }
  0x2f   :  { %v262_v45 = vmax.f32 %v198_v37, 0.0  ;;  %v528_v49 = vpack.c.bf16 %v261_v40, %v260_v35  ;;  %v200_v50 = vadd.f32 %v637_v3, %v132_v41  ;;  %v201_v51 = vadd.f32 %v637_v3, %v133_v42 }
  0x30   :  { %591 = vst [vmem:[%s1052_s3 + $0xb0] sm:$0xff] %v523_v39   ;;  %v136_v52 = vmul.f32 %v632_v2, %v68_v38  ;;  %v263_v53 = vmax.f32 %v199_v44, 0.0  ;;  %v202_v54 = vadd.f32 %v637_v3, %v134_v46  ;;  %v203_v55 = vadd.f32 %v637_v3, %v135_v47 }
  0x31   :  { %v137_v56 = vmul.f32 %v632_v2, %v69_v43  ;;  %592 = vst [vmem:[%s1052_s3 + $0xb8] sm:$0xff] %v528_v49   ;;  %v264_v58 = vmax.f32 %v200_v50, 0.0  ;;  %v265_v59 = vmax.f32 %v201_v51, 0.0  ;;  %v138_v61 = vmul.f32 %v632_v2, %v70_v48 }
  0x32   :  { %v204_v60 = vadd.f32 %v637_v3, %v136_v52  ;;  %v533_v0 = vpack.c.bf16 %v263_v53, %v262_v45  ;;  %v266_v1 = vmax.f32 %v202_v54, 0.0  ;;  %v267_v4 = vmax.f32 %v203_v55, 0.0 }
  0x33   :  { %v205_v5 = vadd.f32 %v637_v3, %v137_v56  ;;  %v538_v8 = vpack.c.bf16 %v265_v59, %v264_v58  ;;  %v139_v10 = vmul.f32 %v632_v2, %v71_v57  ;;  %v206_v11 = vadd.f32 %v637_v3, %v138_v61 }
  0x34   :  { %v268_v9 = vmax.f32 %v204_v60, 0.0  ;;  %593 = vst [vmem:[%s1052_s3 + $0xc0] sm:$0xff] %v533_v0   ;;  %v543_v13 = vpack.c.bf16 %v267_v4, %v266_v1  ;;  %v140_v15 = vmul.f32 %v632_v2, %v72_v62  ;;  %v141_v16 = vmul.f32 %v632_v2, %v73_v63 }
  0x35   :  { %v269_v14 = vmax.f32 %v205_v5, 0.0  ;;  %594 = vst [vmem:[%s1052_s3 + $0xc8] sm:$0xff] %v538_v8   ;;  %v207_v18 = vadd.f32 %v637_v3, %v139_v10  ;;  %v270_v19 = vmax.f32 %v206_v11, 0.0  ;;  %v142_v20 = vmul.f32 %v632_v2, %v74_v6 }
  0x36   :  { %v143_v21 = vmul.f32 %v632_v2, %v75_v7  ;;  %595 = vst [vmem:[%s1052_s3 + $0xd0] sm:$0xff] %v543_v13   ;;  %v208_v23 = vadd.f32 %v637_v3, %v140_v15  ;;  %v209_v24 = vadd.f32 %v637_v3, %v141_v16  ;;  %v144_v25 = vmul.f32 %v632_v2, %v76_v12 }
  0x37   :  { %v548_v22 = vpack.c.bf16 %v269_v14, %v268_v9  ;;  %v271_v26 = vmax.f32 %v207_v18, 0.0  ;;  %v210_v27 = vadd.f32 %v637_v3, %v142_v20  ;;  %v145_v29 = vmul.f32 %v632_v2, %v77_v17 }
  0x38   :  { %v211_v28 = vadd.f32 %v637_v3, %v143_v21  ;;  %v272_v30 = vmax.f32 %v208_v23, 0.0  ;;  %v273_v31 = vmax.f32 %v209_v24, 0.0  ;;  %v212_v32 = vadd.f32 %v637_v3, %v144_v25 }
  0x39   :  { %596 = vst [vmem:[%s1052_s3 + $0xd8] sm:$0xff] %v548_v22   ;;  %v553_v33 = vpack.c.bf16 %v271_v26, %v270_v19  ;;  %v274_v34 = vmax.f32 %v210_v27, 0.0  ;;  %v213_v36 = vadd.f32 %v637_v3, %v145_v29 }
  0x3a   :  { %v275_v35 = vmax.f32 %v211_v28, 0.0  ;;  %v558_v37 = vpack.c.bf16 %v273_v31, %v272_v30  ;;  %v276_v38 = vmax.f32 %v212_v32, 0.0 }
  0x3b   :  { %597 = vst [vmem:[%s1052_s3 + $0xe0] sm:$0xff] %v553_v33   ;;  %v277_v39 = vmax.f32 %v213_v36, 0.0 }
  0x3c   :  { %v563_v2 = vpack.c.bf16 %v275_v35, %v274_v34  ;;  %598 = vst [vmem:[%s1052_s3 + $0xe8] sm:$0xff] %v558_v37  }
  0x3d   :  { %v568_v40 = vpack.c.bf16 %v277_v39, %v276_v38 }
  0x3e   :  { %599 = vst [vmem:[%s1052_s3 + $0xf0] sm:$0xff] %v563_v2  }
  0x3f   :  { %600 = vst [vmem:[%s1052_s3 + $0xf8] sm:$0xff] %v568_v40  }

// kernel: basic_block_2d.4
= control target key start
LH: loop header
LB: loop body
LE: loop exit
PB: predicated region body
PF: predicated region fallthrough
CT: control target
= control target key end

     0   :  { %vm768_vm0 = vcmask 1040384   ;;  %s1626_s1 = inlined_call_operand.vmem [shape: bf16[128,128], index: 1, kind: input, shape index: {}]   ;;  %s1627_s0 = inlined_call_operand.vmem [shape: bf16[512,128], index: 0, kind: input, shape index: {}]   ;;  %s1628_s2 = inlined_call_operand.vmem [shape: f32[512,128], index: 2, kind: output, shape index: {0}]   ;;  %s1629_s3 = inlined_call_operand.vmem [shape: f32[1,2,128], index: 3, kind: output, shape index: {1}]  }
   0x1   :  { %v978_v0 = vld [vmem:[%s1626_s1 + $0x38] sm:$0xff]  ;;  %v977_v1 = vld [vmem:[%s1626_s1 + $0x30] sm:$0xff]  ;;  %v976_v2 = vld [vmem:[%s1626_s1 + $0x28] sm:$0xff] }
   0x2   :  { %333 = vmatpush.bf16.msra.mxu0 %v978_v0  ;;  %979 = vmatpush.bf16.msra.mxu1 %v978_v0  ;;  %v975_v3 = vld [vmem:[%s1626_s1 + $0x20] sm:$0xff]  ;;  %v974_v4 = vld [vmem:[%s1626_s1 + $0x18] sm:$0xff]  ;;  %v973_v5 = vld [vmem:[%s1626_s1 + $0x10] sm:$0xff] }
   0x3   :  { %980 = vmatpush.bf16.msra.mxu2 %v978_v0  ;;  %981 = vmatpush.bf16.msra.mxu3 %v978_v0  ;;  %v972_v6 = vld [vmem:[%s1626_s1 + $0x8] sm:$0xff]  ;;  %v971_v7 = vld [vmem:[%s1626_s1] sm:$0xff]  ;;  %v941_v13 = vld [vmem:[%s1627_s0 + $0x10] sm:$0xff] }
   0x4   :  { %v939_v8 = vld [vmem:[%s1627_s0] sm:$0xff]  ;;  %v940_v10 = vld [vmem:[%s1627_s0 + $0x8] sm:$0xff]  ;;  %v949_v14 = vld [vmem:[%s1627_s0 + $0x50] sm:$0xff] }
   0x5   :  { %v947_v9 = vld [vmem:[%s1627_s0 + $0x40] sm:$0xff]  ;;  %v948_v11 = vld [vmem:[%s1627_s0 + $0x48] sm:$0xff]  ;;  %v942_v16 = vld [vmem:[%s1627_s0 + $0x18] sm:$0xff] }
   0x6   :  { %334 = vmatpush.bf16.msra.mxu0 %v977_v1  ;;  %982 = vmatpush.bf16.msra.mxu1 %v977_v1  ;;  %v955_v12 = vld [vmem:[%s1627_s0 + $0x80] sm:$0xff]  ;;  %v956_v15 = vld [vmem:[%s1627_s0 + $0x88] sm:$0xff]  ;;  %v950_v17 = vld [vmem:[%s1627_s0 + $0x58] sm:$0xff] }
   0x7   :  { %983 = vmatpush.bf16.msra.mxu2 %v977_v1  ;;  %984 = vmatpush.bf16.msra.mxu3 %v977_v1  ;;  %v957_v18 = vld [vmem:[%s1627_s0 + $0x90] sm:$0xff]  ;;  %v963_v19 = vld [vmem:[%s1627_s0 + $0xc0] sm:$0xff]  ;;  %v958_v22 = vld [vmem:[%s1627_s0 + $0x98] sm:$0xff] }
   0x8   :  { %v943_v20 = vld [vmem:[%s1627_s0 + $0x20] sm:$0xff]  ;;  %v964_v23 = vld [vmem:[%s1627_s0 + $0xc8] sm:$0xff]  ;;  %v965_v27 = vld [vmem:[%s1627_s0 + $0xd0] sm:$0xff] }
   0x9   :  { %v951_v21 = vld [vmem:[%s1627_s0 + $0x60] sm:$0xff]  ;;  %v944_v24 = vld [vmem:[%s1627_s0 + $0x28] sm:$0xff]  ;;  %v945_v28 = vld [vmem:[%s1627_s0 + $0x30] sm:$0xff] }
   0xa   :  { %335 = vmatpush.bf16.msra.mxu0 %v976_v2  ;;  %985 = vmatpush.bf16.msra.mxu1 %v976_v2  ;;  %v952_v25 = vld [vmem:[%s1627_s0 + $0x68] sm:$0xff]  ;;  %v959_v26 = vld [vmem:[%s1627_s0 + $0xa0] sm:$0xff]  ;;  %v953_v29 = vld [vmem:[%s1627_s0 + $0x70] sm:$0xff] }
   0xb   :  { %986 = vmatpush.bf16.msra.mxu2 %v976_v2  ;;  %987 = vmatpush.bf16.msra.mxu3 %v976_v2  ;;  %v960_v30 = vld [vmem:[%s1627_s0 + $0xa8] sm:$0xff]  ;;  %v966_v31 = vld [vmem:[%s1627_s0 + $0xd8] sm:$0xff]  ;;  %v961_v34 = vld [vmem:[%s1627_s0 + $0xb0] sm:$0xff] }
   0xc   :  { %v946_v32 = vld [vmem:[%s1627_s0 + $0x38] sm:$0xff]  ;;  %v967_v35 = vld [vmem:[%s1627_s0 + $0xe0] sm:$0xff]  ;;  %v968_v39 = vld [vmem:[%s1627_s0 + $0xe8] sm:$0xff] }
   0xd   :  { %v954_v33 = vld [vmem:[%s1627_s0 + $0x78] sm:$0xff]  ;;  %v969_v51 = vld [vmem:[%s1627_s0 + $0xf0] sm:$0xff] }
   0xe   :  { %336 = vmatpush.bf16.msra.mxu0 %v975_v3  ;;  %988 = vmatpush.bf16.msra.mxu1 %v975_v3  ;;  %v962_v38 = vld [vmem:[%s1627_s0 + $0xb8] sm:$0xff] }
   0xf   :  { %989 = vmatpush.bf16.msra.mxu2 %v975_v3  ;;  %990 = vmatpush.bf16.msra.mxu3 %v975_v3  ;;  %v970_v0 = vld [vmem:[%s1627_s0 + $0xf8] sm:$0xff] }
  0x12   :  { %337 = vmatpush.bf16.msra.mxu0 %v974_v4  ;;  %991 = vmatpush.bf16.msra.mxu1 %v974_v4 }
  0x13   :  { %992 = vmatpush.bf16.msra.mxu2 %v974_v4  ;;  %993 = vmatpush.bf16.msra.mxu3 %v974_v4 }
  0x16   :  { %338 = vmatpush.bf16.msra.mxu0 %v973_v5  ;;  %994 = vmatpush.bf16.msra.mxu1 %v973_v5 }
  0x17   :  { %995 = vmatpush.bf16.msra.mxu2 %v973_v5  ;;  %996 = vmatpush.bf16.msra.mxu3 %v973_v5 }
  0x1a   :  { %339 = vmatpush.bf16.msra.mxu0 %v972_v6  ;;  %997 = vmatpush.bf16.msra.mxu1 %v972_v6 }
  0x1b   :  { %998 = vmatpush.bf16.msra.mxu2 %v972_v6  ;;  %999 = vmatpush.bf16.msra.mxu3 %v972_v6 }
  0x1e   :  { %340 = vmatpush.bf16.msra.mxu0 %v971_v7  ;;  %1000 = vmatpush.bf16.msra.mxu1 %v971_v7 }
  0x1f   :  { %1001 = vmatpush.bf16.msra.mxu2 %v971_v7  ;;  %1002 = vmatpush.bf16.msra.mxu3 %v971_v7 }
  0x21   :  { %341 = vmatmul.bf16.vlgmr.msra.gmra.mxu0 %v939_v8  ;;  %381 = vmatmul.bf16.vlgmr.msra.gmra.mxu1 %v947_v9 }
  0x22   :  { %421 = vmatmul.bf16.vlgmr.msra.gmra.mxu2 %v955_v12  ;;  %461 = vmatmul.bf16.vlgmr.msra.gmra.mxu3 %v963_v19 }
  0x31   :  { %346 = vmatmul.bf16.gmra.mxu0 %v940_v10  ;;  %386 = vmatmul.bf16.gmra.mxu1 %v948_v11 }
  0x32   :  { %426 = vmatmul.bf16.gmra.mxu2 %v956_v15  ;;  %466 = vmatmul.bf16.gmra.mxu3 %v964_v23 }
  0x41   :  { %351 = vmatmul.bf16.gmra.mxu0 %v941_v13  ;;  %391 = vmatmul.bf16.gmra.mxu1 %v949_v14 }
  0x42   :  { %431 = vmatmul.bf16.gmra.mxu2 %v957_v18  ;;  %471 = vmatmul.bf16.gmra.mxu3 %v965_v27 }
  0x51   :  { %356 = vmatmul.bf16.gmra.mxu0 %v942_v16  ;;  %396 = vmatmul.bf16.gmra.mxu1 %v950_v17 }
  0x52   :  { %436 = vmatmul.bf16.gmra.mxu2 %v958_v22  ;;  %476 = vmatmul.bf16.gmra.mxu3 %v966_v31 }
  0x61   :  { %361 = vmatmul.bf16.gmra.mxu0 %v943_v20  ;;  %401 = vmatmul.bf16.gmra.mxu1 %v951_v21 }
  0x62   :  { %441 = vmatmul.bf16.gmra.mxu2 %v959_v26  ;;  %481 = vmatmul.bf16.gmra.mxu3 %v967_v35 }
  0x71   :  { %366 = vmatmul.bf16.gmra.mxu0 %v944_v24  ;;  %406 = vmatmul.bf16.gmra.mxu1 %v952_v25 }
  0x72   :  { %446 = vmatmul.bf16.gmra.mxu2 %v960_v30  ;;  %486 = vmatmul.bf16.gmra.mxu3 %v968_v39 }
  0x81   :  { %371 = vmatmul.bf16.gmra.mxu0 %v945_v28  ;;  %411 = vmatmul.bf16.gmra.mxu1 %v953_v29 }
  0x82   :  { %451 = vmatmul.bf16.gmra.mxu2 %v961_v34  ;;  %491 = vmatmul.bf16.gmra.mxu3 %v969_v51 }
  0x91   :  { %376 = vmatmul.bf16.gmra.mxu0 %v946_v32  ;;  %416 = vmatmul.bf16.gmra.mxu1 %v954_v33 }
  0x92   :  { %456 = vmatmul.bf16.gmra.mxu2 %v962_v38  ;;  %496 = vmatmul.bf16.gmra.mxu3 %v970_v0 }
  0x9e   :  { %v342_v36 = vpop.f32.mrf.mxu0  ;;  %v1131_v37 = vpop.f32.mrf.mxu1 }
  0x9f   :  { %502 = vst [vmem:[%s1628_s2] sm:$0xff] %v342_v36  ;;  %v635_v42 = vmul.f32 %v342_v36, %v342_v36 }
  0xa0   :  { %518 = vst [vmem:[%s1628_s2 + $0x80] sm:$0xff] %v1131_v37 }
  0xa5   :  { %v1172_v56 = vpop.f32.mrf.mxu2  ;;  %v1241_v10 = vpop.f32.mrf.mxu3 }
  0xa6   :  { %v344_v40 = vpop.f32.mrf.mxu0  ;;  %v1146_v41 = vpop.f32.mrf.mxu1  ;;  %534 = vst [vmem:[%s1628_s2 + $0x100] sm:$0xff] %v1172_v56 }
  0xa7   :  { %503 = vst [vmem:[%s1628_s2 + $0x8] sm:$0xff] %v344_v40  ;;  %v566_v43 = vadd.f32 %v344_v40, %v342_v36  ;;  %v636_v44 = vmul.f32 %v344_v40, %v344_v40 }
  0xa8   :  { %519 = vst [vmem:[%s1628_s2 + $0x88] sm:$0xff] %v1146_v41 }
  0xa9   :  { %v699_v45 = vadd.f32 %v636_v44, %v635_v42  ;;  %550 = vst [vmem:[%s1628_s2 + $0x180] sm:$0xff] %v1241_v10 }
  0xad   :  { %v1189_v62 = vpop.f32.mrf.mxu2  ;;  %v1262_v14 = vpop.f32.mrf.mxu3 }
  0xae   :  { %v347_v46 = vpop.f32.mrf.mxu0  ;;  %v1155_v47 = vpop.f32.mrf.mxu1  ;;  %535 = vst [vmem:[%s1628_s2 + $0x108] sm:$0xff] %v1189_v62 }
  0xaf   :  { %504 = vst [vmem:[%s1628_s2 + $0x10] sm:$0xff] %v347_v46  ;;  %v567_v48 = vadd.f32 %v566_v43, %v347_v46  ;;  %v637_v49 = vmul.f32 %v347_v46, %v347_v46 }
  0xb0   :  { %520 = vst [vmem:[%s1628_s2 + $0x90] sm:$0xff] %v1155_v47 }
  0xb1   :  { %v700_v50 = vadd.f32 %v699_v45, %v637_v49  ;;  %551 = vst [vmem:[%s1628_s2 + $0x188] sm:$0xff] %v1262_v14 }
  0xb5   :  { %v1209_v3 = vpop.f32.mrf.mxu2  ;;  %v1283_v18 = vpop.f32.mrf.mxu3 }
  0xb6   :  { %v349_v52 = vpop.f32.mrf.mxu0  ;;  %v1167_v53 = vpop.f32.mrf.mxu1  ;;  %536 = vst [vmem:[%s1628_s2 + $0x110] sm:$0xff] %v1209_v3 }
  0xb7   :  { %505 = vst [vmem:[%s1628_s2 + $0x18] sm:$0xff] %v349_v52  ;;  %v568_v54 = vadd.f32 %v567_v48, %v349_v52  ;;  %v638_v55 = vmul.f32 %v349_v52, %v349_v52 }
  0xb8   :  { %521 = vst [vmem:[%s1628_s2 + $0x98] sm:$0xff] %v1167_v53 }
  0xb9   :  { %v701_v57 = vadd.f32 %v700_v50, %v638_v55  ;;  %552 = vst [vmem:[%s1628_s2 + $0x190] sm:$0xff] %v1283_v18 }
  0xbd   :  { %v1224_v6 = vpop.f32.mrf.mxu2  ;;  %v1304_v22 = vpop.f32.mrf.mxu3 }
  0xbe   :  { %v352_v58 = vpop.f32.mrf.mxu0  ;;  %v1182_v59 = vpop.f32.mrf.mxu1  ;;  %537 = vst [vmem:[%s1628_s2 + $0x118] sm:$0xff] %v1224_v6 }
  0xbf   :  { %506 = vst [vmem:[%s1628_s2 + $0x20] sm:$0xff] %v352_v58  ;;  %v1187_v60 = vadd.f32 %v568_v54, %v352_v58  ;;  %v639_v61 = vmul.f32 %v352_v58, %v352_v58 }
  0xc0   :  { %522 = vst [vmem:[%s1628_s2 + $0xa0] sm:$0xff] %v1182_v59 }
  0xc1   :  { %v1195_v63 = vadd.f32 %v701_v57, %v639_v61  ;;  %553 = vst [vmem:[%s1628_s2 + $0x198] sm:$0xff] %v1304_v22 }
  0xc5   :  { %v1239_v9 = vpop.f32.mrf.mxu2  ;;  %v1325_v26 = vpop.f32.mrf.mxu3 }
  0xc6   :  { %v354_v1 = vpop.f32.mrf.mxu0  ;;  %v1204_v2 = vpop.f32.mrf.mxu1  ;;  %538 = vst [vmem:[%s1628_s2 + $0x120] sm:$0xff] %v1239_v9 }
  0xc7   :  { %507 = vst [vmem:[%s1628_s2 + $0x28] sm:$0xff] %v354_v1  ;;  %v640_v31 = vmul.f32 %v354_v1, %v354_v1  ;;  %v570_v32 = vadd.f32 %v1187_v60, %v354_v1 }
  0xc8   :  { %523 = vst [vmem:[%s1628_s2 + $0xa8] sm:$0xff] %v1204_v2 }
  0xc9   :  { %554 = vst [vmem:[%s1628_s2 + $0x1a0] sm:$0xff] %v1325_v26  ;;  %v703_v34 = vadd.f32 %v1195_v63, %v640_v31 }
  0xcd   :  { %v1260_v13 = vpop.f32.mrf.mxu2  ;;  %v1346_v30 = vpop.f32.mrf.mxu3 }
  0xce   :  { %v357_v4 = vpop.f32.mrf.mxu0  ;;  %v1219_v5 = vpop.f32.mrf.mxu1  ;;  %539 = vst [vmem:[%s1628_s2 + $0x128] sm:$0xff] %v1260_v13 }
  0xcf   :  { %508 = vst [vmem:[%s1628_s2 + $0x30] sm:$0xff] %v357_v4  ;;  %v641_v33 = vmul.f32 %v357_v4, %v357_v4  ;;  %v571_v35 = vadd.f32 %v570_v32, %v357_v4 }
  0xd0   :  { %524 = vst [vmem:[%s1628_s2 + $0xb0] sm:$0xff] %v1219_v5 }
  0xd1   :  { %555 = vst [vmem:[%s1628_s2 + $0x1a8] sm:$0xff] %v1346_v30  ;;  %v704_v40 = vadd.f32 %v703_v34, %v641_v33 }
  0xd5   :  { %v1281_v17 = vpop.f32.mrf.mxu2  ;;  %v1369_v45 = vpop.f32.mrf.mxu3 }
  0xd6   :  { %v359_v7 = vpop.f32.mrf.mxu0  ;;  %v1234_v8 = vpop.f32.mrf.mxu1  ;;  %540 = vst [vmem:[%s1628_s2 + $0x130] sm:$0xff] %v1281_v17 }
  0xd7   :  { %509 = vst [vmem:[%s1628_s2 + $0x38] sm:$0xff] %v359_v7  ;;  %v642_v36 = vmul.f32 %v359_v7, %v359_v7  ;;  %v572_v42 = vadd.f32 %v571_v35, %v359_v7 }
  0xd8   :  { %525 = vst [vmem:[%s1628_s2 + $0xb8] sm:$0xff] %v1234_v8 }
  0xd9   :  { %v705_v46 = vadd.f32 %v704_v40, %v642_v36  ;;  %556 = vst [vmem:[%s1628_s2 + $0x1b0] sm:$0xff] %v1369_v45 }
  0xdd   :  { %v1302_v21 = vpop.f32.mrf.mxu2  ;;  %v1390_v4 = vpop.f32.mrf.mxu3 }
  0xde   :  { %v362_v11 = vpop.f32.mrf.mxu0  ;;  %v1255_v12 = vpop.f32.mrf.mxu1  ;;  %541 = vst [vmem:[%s1628_s2 + $0x138] sm:$0xff] %v1302_v21 }
  0xdf   :  { %510 = vst [vmem:[%s1628_s2 + $0x40] sm:$0xff] %v362_v11  ;;  %v643_v43 = vmul.f32 %v362_v11, %v362_v11  ;;  %v573_v48 = vadd.f32 %v572_v42, %v362_v11 }
  0xe0   :  { %526 = vst [vmem:[%s1628_s2 + $0xc0] sm:$0xff] %v1255_v12 }
  0xe1   :  { %v706_v50 = vadd.f32 %v705_v46, %v643_v43  ;;  %557 = vst [vmem:[%s1628_s2 + $0x1b8] sm:$0xff] %v1390_v4 }
  0xe5   :  { %v1323_v25 = vpop.f32.mrf.mxu2  ;;  %v1411_v43 = vpop.f32.mrf.mxu3 }
  0xe6   :  { %v364_v15 = vpop.f32.mrf.mxu0  ;;  %v1276_v16 = vpop.f32.mrf.mxu1  ;;  %542 = vst [vmem:[%s1628_s2 + $0x140] sm:$0xff] %v1323_v25 }
  0xe7   :  { %511 = vst [vmem:[%s1628_s2 + $0x48] sm:$0xff] %v364_v15  ;;  %v644_v49 = vmul.f32 %v364_v15, %v364_v15  ;;  %v574_v51 = vadd.f32 %v573_v48, %v364_v15 }
  0xe8   :  { %527 = vst [vmem:[%s1628_s2 + $0xc8] sm:$0xff] %v1276_v16 }
  0xe9   :  { %v707_v54 = vadd.f32 %v706_v50, %v644_v49  ;;  %558 = vst [vmem:[%s1628_s2 + $0x1c0] sm:$0xff] %v1411_v43  ;;  %v652_v49 = vmul.f32 %v1146_v41, %v1146_v41 }
  0xed   :  { %v1344_v29 = vpop.f32.mrf.mxu2 }
  0xee   :  { %v367_v19 = vpop.f32.mrf.mxu0  ;;  %v1297_v20 = vpop.f32.mrf.mxu1  ;;  %543 = vst [vmem:[%s1628_s2 + $0x148] sm:$0xff] %v1344_v29 }
  0xef   :  { %512 = vst [vmem:[%s1628_s2 + $0x50] sm:$0xff] %v367_v19  ;;  %v645_v52 = vmul.f32 %v367_v19, %v367_v19  ;;  %v575_v55 = vadd.f32 %v574_v51, %v367_v19 }
  0xf0   :  { %528 = vst [vmem:[%s1628_s2 + $0xd0] sm:$0xff] %v1297_v20 }
  0xf1   :  { %v708_v61 = vadd.f32 %v707_v54, %v645_v52 }
  0xf5   :  { %v1367_v44 = vpop.f32.mrf.mxu2 }
  0xf6   :  { %v369_v23 = vpop.f32.mrf.mxu0  ;;  %v1318_v24 = vpop.f32.mrf.mxu1  ;;  %544 = vst [vmem:[%s1628_s2 + $0x150] sm:$0xff] %v1367_v44 }
  0xf7   :  { %513 = vst [vmem:[%s1628_s2 + $0x58] sm:$0xff] %v369_v23  ;;  %v646_v57 = vmul.f32 %v369_v23, %v369_v23  ;;  %v576_v63 = vadd.f32 %v575_v55, %v369_v23  ;;  %v654_v55 = vmul.f32 %v1167_v53, %v1167_v53 }
  0xf8   :  { %529 = vst [vmem:[%s1628_s2 + $0xd8] sm:$0xff] %v1318_v24 }
  0xf9   :  { %v709_v7 = vadd.f32 %v708_v61, %v646_v57 }
  0xfd   :  { %v1388_v1 = vpop.f32.mrf.mxu2 }
  0xfe   :  { %v372_v27 = vpop.f32.mrf.mxu0  ;;  %v1339_v28 = vpop.f32.mrf.mxu1  ;;  %545 = vst [vmem:[%s1628_s2 + $0x158] sm:$0xff] %v1388_v1 }
  0xff   :  { %514 = vst [vmem:[%s1628_s2 + $0x60] sm:$0xff] %v372_v27  ;;  %v647_v0 = vmul.f32 %v372_v27, %v372_v27  ;;  %v577_v11 = vadd.f32 %v576_v63, %v372_v27  ;;  %v1439_v63 = vpop.f32.mrf.mxu3 }
 0x100   :  { %530 = vst [vmem:[%s1628_s2 + $0xe0] sm:$0xff] %v1339_v28 }
 0x101   :  { %v710_v19 = vadd.f32 %v709_v7, %v647_v0  ;;  %559 = vst [vmem:[%s1628_s2 + $0x1c8] sm:$0xff] %v1439_v63 }
 0x105   :  { %v1409_v42 = vpop.f32.mrf.mxu2 }
 0x106   :  { %v374_v38 = vpop.f32.mrf.mxu0  ;;  %v1362_v39 = vpop.f32.mrf.mxu1  ;;  %546 = vst [vmem:[%s1628_s2 + $0x160] sm:$0xff] %v1409_v42 }
 0x107   :  { %515 = vst [vmem:[%s1628_s2 + $0x68] sm:$0xff] %v374_v38  ;;  %v648_v15 = vmul.f32 %v374_v38, %v374_v38  ;;  %v578_v23 = vadd.f32 %v577_v11, %v374_v38  ;;  %v651_v38 = vmul.f32 %v1131_v37, %v1131_v37 }
 0x108   :  { %531 = vst [vmem:[%s1628_s2 + $0xe8] sm:$0xff] %v1362_v39 }
 0x109   :  { %v711_v32 = vadd.f32 %v710_v19, %v648_v15  ;;  %v657_v15 = vmul.f32 %v1219_v5, %v1219_v5 }
 0x10d   :  { %v1437_v61 = vpop.f32.mrf.mxu2 }
 0x10e   :  { %v377_v58 = vpop.f32.mrf.mxu0  ;;  %v1383_v60 = vpop.f32.mrf.mxu1  ;;  %547 = vst [vmem:[%s1628_s2 + $0x168] sm:$0xff] %v1437_v61 }
 0x10f   :  { %516 = vst [vmem:[%s1628_s2 + $0x70] sm:$0xff] %v377_v58  ;;  %v649_v31 = vmul.f32 %v377_v58, %v377_v58  ;;  %v579_v33 = vadd.f32 %v578_v23, %v377_v58 }
 0x110   :  { %532 = vst [vmem:[%s1628_s2 + $0xf0] sm:$0xff] %v1383_v60 }
 0x111   :  { %v712_v27 = vadd.f32 %v711_v32, %v649_v31 }
 0x116   :  { %v379_v34 = vpop.f32.mrf.mxu0  ;;  %v1404_v35 = vpop.f32.mrf.mxu1 }
 0x117   :  { %517 = vst [vmem:[%s1628_s2 + $0x78] sm:$0xff] %v379_v34  ;;  %v580_v36 = vadd.f32 %v579_v33, %v379_v34  ;;  %v650_v40 = vmul.f32 %v379_v34, %v379_v34  ;;  %v1461_v33 = vpop.f32.mrf.mxu2  ;;  %v1463_v34 = vpop.f32.mrf.mxu3 }
 0x118   :  { %533 = vst [vmem:[%s1628_s2 + $0xf8] sm:$0xff] %v1404_v35 }
 0x119   :  { %v581_v46 = vadd.f32 %v580_v36, %v1131_v37  ;;  %v713_v48 = vadd.f32 %v712_v27, %v650_v40  ;;  %v653_v37 = vmul.f32 %v1155_v47, %v1155_v47  ;;  %548 = vst [vmem:[%s1628_s2 + $0x170] sm:$0xff] %v1461_v33 }
 0x11a   :  { %560 = vst [vmem:[%s1628_s2 + $0x1d0] sm:$0xff] %v1463_v34 }
 0x11b   :  { %v582_v50 = vadd.f32 %v581_v46, %v1146_v41  ;;  %v714_v51 = vadd.f32 %v713_v48, %v651_v38  ;;  %v655_v41 = vmul.f32 %v1182_v59, %v1182_v59  ;;  %v661_v38 = vmul.f32 %v1297_v20, %v1297_v20 }
 0x11d   :  { %v583_v52 = vadd.f32 %v582_v50, %v1155_v47  ;;  %v715_v54 = vadd.f32 %v714_v51, %v652_v49 }
 0x11f   :  { %v584_v57 = vadd.f32 %v583_v52, %v1167_v53  ;;  %v716_v58 = vadd.f32 %v715_v54, %v653_v37  ;;  %v656_v53 = vmul.f32 %v1204_v2, %v1204_v2  ;;  %v1485_v51 = vpop.f32.mrf.mxu2  ;;  %v1487_v37 = vpop.f32.mrf.mxu3 }
 0x120   :  { %549 = vst [vmem:[%s1628_s2 + $0x178] sm:$0xff] %v1485_v51 }
 0x121   :  { %v585_v47 = vadd.f32 %v584_v57, %v1182_v59  ;;  %v717_v0 = vadd.f32 %v716_v58, %v654_v55  ;;  %v658_v59 = vmul.f32 %v1234_v8, %v1234_v8  ;;  %561 = vst [vmem:[%s1628_s2 + $0x1d8] sm:$0xff] %v1487_v37  ;;  %v664_v55 = vmul.f32 %v1362_v39, %v1362_v39 }
 0x123   :  { %v586_v7 = vadd.f32 %v585_v47, %v1204_v2  ;;  %v718_v11 = vadd.f32 %v717_v0, %v655_v41  ;;  %v659_v2 = vmul.f32 %v1255_v12, %v1255_v12  ;;  %v665_v41 = vmul.f32 %v1383_v60, %v1383_v60 }
 0x124   :  { %v666_v0 = vmul.f32 %v1404_v35, %v1404_v35 }
 0x125   :  { %v719_v19 = vadd.f32 %v718_v11, %v656_v53  ;;  %v587_v23 = vadd.f32 %v586_v7, %v1219_v5 }
 0x127   :  { %v588_v31 = vadd.f32 %v587_v23, %v1234_v8  ;;  %v720_v32 = vadd.f32 %v719_v19, %v657_v15  ;;  %v660_v8 = vmul.f32 %v1276_v16, %v1276_v16  ;;  %v1509_v53 = vpop.f32.mrf.mxu3 }
 0x128   :  { %562 = vst [vmem:[%s1628_s2 + $0x1e0] sm:$0xff] %v1509_v53 }
 0x129   :  { %v589_v5 = vadd.f32 %v588_v31, %v1255_v12  ;;  %v721_v27 = vadd.f32 %v720_v32, %v658_v59  ;;  %v662_v12 = vmul.f32 %v1318_v24, %v1318_v24  ;;  %v670_v31 = vmul.f32 %v1224_v6, %v1224_v6 }
 0x12b   :  { %v590_v36 = vadd.f32 %v589_v5, %v1276_v16  ;;  %v722_v40 = vadd.f32 %v721_v27, %v659_v2  ;;  %v672_v27 = vmul.f32 %v1260_v13, %v1260_v13 }
 0x12d   :  { %v591_v46 = vadd.f32 %v590_v36, %v1297_v20  ;;  %v723_v48 = vadd.f32 %v722_v40, %v660_v8  ;;  %v663_v20 = vmul.f32 %v1339_v28, %v1339_v28  ;;  %v673_v36 = vmul.f32 %v1281_v17, %v1281_v17 }
 0x12f   :  { %v592_v49 = vadd.f32 %v591_v46, %v1318_v24  ;;  %v724_v50 = vadd.f32 %v723_v48, %v661_v38  ;;  %v674_v46 = vmul.f32 %v1302_v21, %v1302_v21 }
 0x131   :  { %v593_v16 = vadd.f32 %v592_v49, %v1339_v28  ;;  %v725_v52 = vadd.f32 %v724_v50, %v662_v12 }
 0x133   :  { %v726_v24 = vadd.f32 %v725_v52, %v663_v20  ;;  %v594_v54 = vadd.f32 %v593_v16, %v1362_v39  ;;  %v667_v39 = vmul.f32 %v1172_v56, %v1172_v56  ;;  %v677_v20 = vmul.f32 %v1367_v44, %v1367_v44 }
 0x135   :  { %v727_v57 = vadd.f32 %v726_v24, %v664_v55  ;;  %v595_v58 = vadd.f32 %v594_v54, %v1383_v60  ;;  %v668_v60 = vmul.f32 %v1189_v62, %v1189_v62  ;;  %v678_v55 = vmul.f32 %v1388_v1, %v1388_v1 }
 0x137   :  { %v728_v47 = vadd.f32 %v727_v57, %v665_v41  ;;  %v596_v28 = vadd.f32 %v595_v58, %v1404_v35  ;;  %v669_v35 = vmul.f32 %v1209_v3, %v1209_v3  ;;  %v679_v41 = vmul.f32 %v1409_v42, %v1409_v42 }
 0x139   :  { %v597_v7 = vadd.f32 %v596_v28, %v1172_v56  ;;  %v729_v11 = vadd.f32 %v728_v47, %v666_v0  ;;  %v1527_v56 = vpop.f32.mrf.mxu3  ;;  %v680_v28 = vmul.f32 %v1437_v61, %v1437_v61 }
 0x13a   :  { %563 = vst [vmem:[%s1628_s2 + $0x1e8] sm:$0xff] %v1527_v56 }
 0x13b   :  { %v598_v15 = vadd.f32 %v597_v7, %v1189_v62  ;;  %v730_v19 = vadd.f32 %v729_v11, %v667_v39  ;;  %v671_v62 = vmul.f32 %v1239_v9, %v1239_v9  ;;  %v681_v39 = vmul.f32 %v1461_v33, %v1461_v33 }
 0x13d   :  { %v599_v23 = vadd.f32 %v598_v15, %v1209_v3  ;;  %v731_v59 = vadd.f32 %v730_v19, %v668_v60  ;;  %v682_v60 = vmul.f32 %v1485_v51, %v1485_v51 }
 0x13f   :  { %v600_v32 = vadd.f32 %v599_v23, %v1224_v6  ;;  %v732_v2 = vadd.f32 %v731_v59, %v669_v35 }
 0x141   :  { %v601_v5 = vadd.f32 %v600_v32, %v1239_v9  ;;  %v733_v3 = vadd.f32 %v732_v2, %v670_v31  ;;  %v1545_v9 = vpop.f32.mrf.mxu3 }
 0x142   :  { %564 = vst [vmem:[%s1628_s2 + $0x1f0] sm:$0xff] %v1545_v9 }
 0x143   :  { %v602_v8 = vadd.f32 %v601_v5, %v1260_v13  ;;  %v734_v6 = vadd.f32 %v733_v3, %v671_v62  ;;  %v675_v13 = vmul.f32 %v1323_v25, %v1323_v25 }
 0x145   :  { %v735_v40 = vadd.f32 %v734_v6, %v672_v27  ;;  %v603_v38 = vadd.f32 %v602_v8, %v1281_v17  ;;  %v676_v17 = vmul.f32 %v1344_v29, %v1344_v29 }
 0x147   :  { %v604_v48 = vadd.f32 %v603_v38, %v1302_v21  ;;  %v736_v12 = vadd.f32 %v735_v40, %v673_v36 }
 0x149   :  { %v605_v49 = vadd.f32 %v604_v48, %v1323_v25  ;;  %v737_v50 = vadd.f32 %v736_v12, %v674_v46  ;;  %v499_v25 = vpop.f32.mrf.mxu3 }
 0x14a   :  { %565 = vst [vmem:[%s1628_s2 + $0x1f8] sm:$0xff] %v499_v25 }
 0x14b   :  { %v606_v16 = vadd.f32 %v605_v49, %v1344_v29  ;;  %v738_v21 = vadd.f32 %v737_v50, %v675_v13  ;;  %v694_v50 = vmul.f32 %v1487_v37, %v1487_v37 }
 0x14d   :  { %v607_v52 = vadd.f32 %v606_v16, %v1367_v44  ;;  %v739_v24 = vadd.f32 %v738_v21, %v676_v17  ;;  %v695_v21 = vmul.f32 %v1509_v53, %v1509_v53 }
 0x14f   :  { %v608_v54 = vadd.f32 %v607_v52, %v1388_v1  ;;  %v740_v57 = vadd.f32 %v739_v24, %v677_v20  ;;  %v696_v52 = vmul.f32 %v1527_v56, %v1527_v56 }
 0x151   :  { %v741_v58 = vadd.f32 %v740_v57, %v678_v55  ;;  %v609_v29 = vadd.f32 %v608_v54, %v1409_v42  ;;  %v683_v42 = vmul.f32 %v1241_v10, %v1241_v10  ;;  %v697_v54 = vmul.f32 %v1545_v9, %v1545_v9 }
 0x152   :  { %v698_v57 = vmul.f32 %v499_v25, %v499_v25 }
 0x153   :  { %v742_v47 = vadd.f32 %v741_v58, %v679_v41  ;;  %v610_v44 = vadd.f32 %v609_v29, %v1437_v61  ;;  %v684_v61 = vmul.f32 %v1262_v14, %v1262_v14 }
 0x155   :  { %v743_v0 = vadd.f32 %v742_v47, %v680_v28  ;;  %v611_v1 = vadd.f32 %v610_v44, %v1461_v33  ;;  %v685_v33 = vmul.f32 %v1283_v18, %v1283_v18 }
 0x157   :  { %v744_v7 = vadd.f32 %v743_v0, %v681_v39  ;;  %v612_v11 = vadd.f32 %v611_v1, %v1485_v51  ;;  %v686_v51 = vmul.f32 %v1304_v22, %v1304_v22 }
 0x159   :  { %v613_v15 = vadd.f32 %v612_v11, %v1241_v10  ;;  %v745_v19 = vadd.f32 %v744_v7, %v682_v60  ;;  %v687_v10 = vmul.f32 %v1325_v26, %v1325_v26 }
 0x15b   :  { %v614_v35 = vadd.f32 %v613_v15, %v1262_v14  ;;  %v746_v23 = vadd.f32 %v745_v19, %v683_v42  ;;  %v688_v14 = vmul.f32 %v1346_v30, %v1346_v30 }
 0x15d   :  { %v615_v59 = vadd.f32 %v614_v35, %v1283_v18  ;;  %v747_v31 = vadd.f32 %v746_v23, %v684_v61  ;;  %v689_v18 = vmul.f32 %v1369_v45, %v1369_v45 }
 0x15f   :  { %v616_v32 = vadd.f32 %v615_v59, %v1304_v22  ;;  %v748_v2 = vadd.f32 %v747_v31, %v685_v33  ;;  %v690_v22 = vmul.f32 %v1390_v4, %v1390_v4 }
 0x161   :  { %v617_v62 = vadd.f32 %v616_v32, %v1325_v26  ;;  %v749_v5 = vadd.f32 %v748_v2, %v686_v51  ;;  %v691_v26 = vmul.f32 %v1411_v43, %v1411_v43 }
 0x163   :  { %v618_v3 = vadd.f32 %v617_v62, %v1346_v30  ;;  %v750_v27 = vadd.f32 %v749_v5, %v687_v10  ;;  %v692_v30 = vmul.f32 %v1439_v63, %v1439_v63 }
 0x165   :  { %v751_v8 = vadd.f32 %v750_v27, %v688_v14  ;;  %v619_v6 = vadd.f32 %v618_v3, %v1369_v45  ;;  %v693_v45 = vmul.f32 %v1463_v34, %v1463_v34 }
 0x167   :  { %v620_v36 = vadd.f32 %v619_v6, %v1390_v4  ;;  %v752_v40 = vadd.f32 %v751_v8, %v689_v18 }
 0x169   :  { %v621_v38 = vadd.f32 %v620_v36, %v1411_v43  ;;  %v753_v46 = vadd.f32 %v752_v40, %v690_v22 }
 0x16b   :  { %v622_v48 = vadd.f32 %v621_v38, %v1439_v63  ;;  %v754_v12 = vadd.f32 %v753_v46, %v691_v26 }
 0x16d   :  { %v623_v13 = vadd.f32 %v622_v48, %v1463_v34  ;;  %v755_v49 = vadd.f32 %v754_v12, %v692_v30 }
 0x16f   :  { %v624_v4 = vadd.f32 %v623_v13, %v1487_v37  ;;  %v756_v17 = vadd.f32 %v755_v49, %v693_v45 }
 0x171   :  { %v757_v43 = vadd.f32 %v756_v17, %v694_v50  ;;  %v625_v16 = vadd.f32 %v624_v4, %v1509_v53 }
 0x173   :  { %v758_v63 = vadd.f32 %v757_v43, %v695_v21  ;;  %v626_v20 = vadd.f32 %v625_v16, %v1527_v56 }
 0x175   :  { %v759_v34 = vadd.f32 %v758_v63, %v696_v52  ;;  %v627_v24 = vadd.f32 %v626_v20, %v1545_v9 }
 0x177   :  { %v760_v37 = vadd.f32 %v759_v34, %v697_v54  ;;  %v628_v55 = vadd.f32 %v627_v24, %v499_v25 }
 0x179   :  { %v629_v58 = vrot.slane %v628_v55, 4  ;;  %v761_v29 = vadd.f32 %v760_v37, %v698_v57 }
 0x17b   :  { %v630_v41 = vadd.f32 %v629_v58, %v628_v55  ;;  %v762_v47 = vrot.slane %v761_v29, 4 }
 0x17d   :  { %v631_v53 = vrot.slane %v630_v41, 2  ;;  %v763_v44 = vadd.f32 %v762_v47, %v761_v29 }
 0x17f   :  { %v632_v28 = vadd.f32 %v631_v53, %v630_v41  ;;  %v764_v0 = vrot.slane %v763_v44, 2 }
 0x181   :  { %v633_v1 = vrot.slane %v632_v28, 1  ;;  %v765_v39 = vadd.f32 %v764_v0, %v763_v44 }
 0x183   :  { %v766_v56 = vrot.slane %v765_v39, 1  ;;  %v634_v7 = vadd.f32 %v633_v1, %v632_v28 }
 0x185   :  { %v767_v11 = vadd.f32 %v766_v56, %v765_v39 }
 0x187   :  { %v769_v60 = vsel %vm768_vm0, %v634_v7, %v767_v11 }
 0x188   :  { %770 = vst [vmem:[%s1629_s3] sm:$0x3] %v769_v60 }

// kernel: basic_block_2d.7
= control target key start
LH: loop header
LB: loop body
LE: loop exit
PB: predicated region body
PF: predicated region fallthrough
CT: control target
= control target key end

     0   :  { %s1218_s0 = inlined_call_operand.vmem [shape: f32[512,128], index: 0, kind: input, shape index: {}]   ;;  %s1219_s1 = inlined_call_operand.vmem [shape: f32[1,128], index: 1, kind: input, shape index: {}]   ;;  %s1220_s2 = inlined_call_operand.vmem [shape: f32[1,128], index: 2, kind: input, shape index: {}]   ;;  %s1221_s3 = inlined_call_operand.vmem [shape: f32[512,128], index: 3, kind: input, shape index: {}]   ;;  %s1222_s4 = inlined_call_operand.vmem [shape: f32[512,128], index: 4, kind: output, shape index: {}]  }
   0x1   :  { %v17_v0 = vld [vmem:[%s1218_s0] sm:$0xff]  ;;  %v18_v4 = vld [vmem:[%s1218_s0 + $0x8] sm:$0xff]  ;;  %v19_v5 = vld [vmem:[%s1218_s0 + $0x10] sm:$0xff] }
   0x2   :  { %v510_v1 = vld [vmem:[%s1219_s1] ss:$0 sm:$0xff]  ;;  %v218_v8 = vld [vmem:[%s1221_s3 + $0x8] sm:$0xff]  ;;  %v20_v10 = vld [vmem:[%s1218_s0 + $0x18] sm:$0xff] }
   0x3   :  { %v515_v2 = vld [vmem:[%s1220_s2] ss:$0 sm:$0xff]  ;;  %v85_v3 = vmul.f32 %v510_v1, %v17_v0  ;;  %v86_v7 = vmul.f32 %v510_v1, %v18_v4  ;;  %v87_v9 = vmul.f32 %v510_v1, %v19_v5  ;;  %v219_v12 = vld [vmem:[%s1221_s3 + $0x10] sm:$0xff]  ;;  %v88_v13 = vmul.f32 %v510_v1, %v20_v10  ;;  %v22_v15 = vld [vmem:[%s1218_s0 + $0x28] sm:$0xff] }
   0x4   :  { %v217_v6 = vld [vmem:[%s1221_s3] sm:$0xff]  ;;  %v220_v18 = vld [vmem:[%s1221_s3 + $0x18] sm:$0xff]  ;;  %v90_v20 = vmul.f32 %v510_v1, %v22_v15  ;;  %v23_v21 = vld [vmem:[%s1218_s0 + $0x30] sm:$0xff] }
   0x5   :  { %v153_v11 = vadd.f32 %v515_v2, %v85_v3  ;;  %v21_v14 = vld [vmem:[%s1218_s0 + $0x20] sm:$0xff]  ;;  %v154_v16 = vadd.f32 %v515_v2, %v86_v7  ;;  %v155_v17 = vadd.f32 %v515_v2, %v87_v9  ;;  %v156_v23 = vadd.f32 %v515_v2, %v88_v13  ;;  %v222_v25 = vld [vmem:[%s1221_s3 + $0x28] sm:$0xff]  ;;  %v24_v27 = vld [vmem:[%s1218_s0 + $0x38] sm:$0xff] }
   0x6   :  { %v89_v19 = vmul.f32 %v510_v1, %v21_v14  ;;  %v221_v24 = vld [vmem:[%s1221_s3 + $0x20] sm:$0xff]  ;;  %v91_v26 = vmul.f32 %v510_v1, %v23_v21  ;;  %v158_v31 = vadd.f32 %v515_v2, %v90_v20  ;;  %v223_v32 = vld [vmem:[%s1221_s3 + $0x30] sm:$0xff]  ;;  %v92_v37 = vmul.f32 %v510_v1, %v24_v27  ;;  %v26_v38 = vld [vmem:[%s1218_s0 + $0x48] sm:$0xff] }
   0x7   :  { %v281_v22 = vadd.f32 %v217_v6, %v153_v11  ;;  %v282_v28 = vadd.f32 %v218_v8, %v154_v16  ;;  %v283_v29 = vadd.f32 %v219_v12, %v155_v17  ;;  %v25_v33 = vld [vmem:[%s1218_s0 + $0x40] sm:$0xff]  ;;  %v284_v35 = vadd.f32 %v220_v18, %v156_v23  ;;  %v27_v39 = vld [vmem:[%s1218_s0 + $0x50] sm:$0xff]  ;;  %v224_v44 = vld [vmem:[%s1221_s3 + $0x38] sm:$0xff] }
   0x8   :  { %v157_v30 = vadd.f32 %v515_v2, %v89_v19  ;;  %v159_v36 = vadd.f32 %v515_v2, %v91_v26  ;;  %v286_v43 = vadd.f32 %v222_v25, %v158_v31  ;;  %v28_v45 = vld [vmem:[%s1218_s0 + $0x58] sm:$0xff]  ;;  %v160_v48 = vadd.f32 %v515_v2, %v92_v37  ;;  %v29_v50 = vld [vmem:[%s1218_s0 + $0x60] sm:$0xff]  ;;  %v30_v51 = vld [vmem:[%s1218_s0 + $0x68] sm:$0xff] }
   0x9   :  { %v345_v34 = vmax.f32 %v281_v22, 0.0  ;;  %v346_v40 = vmax.f32 %v282_v28, 0.0  ;;  %v347_v41 = vmax.f32 %v283_v29, 0.0  ;;  %v348_v46 = vmax.f32 %v284_v35, 0.0  ;;  %v225_v54 = vld [vmem:[%s1221_s3 + $0x40] sm:$0xff]  ;;  %v31_v57 = vld [vmem:[%s1218_s0 + $0x70] sm:$0xff] }
   0xa   :  { %v285_v42 = vadd.f32 %v221_v24, %v157_v30  ;;  %v287_v47 = vadd.f32 %v223_v32, %v159_v36  ;;  %v93_v49 = vmul.f32 %v510_v1, %v25_v33  ;;  %v350_v53 = vmax.f32 %v286_v43, 0.0  ;;  %v226_v61 = vld [vmem:[%s1221_s3 + $0x48] sm:$0xff]  ;;  %v227_v62 = vld [vmem:[%s1221_s3 + $0x50] sm:$0xff]  ;;  %v228_v4 = vld [vmem:[%s1221_s3 + $0x58] sm:$0xff] }
   0xb   :  { %409 = vst [vmem:[%s1222_s4] sm:$0xff] %v345_v34  ;;  %v94_v55 = vmul.f32 %v510_v1, %v26_v38  ;;  %v95_v56 = vmul.f32 %v510_v1, %v27_v39  ;;  %v288_v59 = vadd.f32 %v224_v44, %v160_v48  ;;  %v96_v63 = vmul.f32 %v510_v1, %v28_v45  ;;  %v32_v7 = vld [vmem:[%s1218_s0 + $0x78] sm:$0xff]  ;;  %v229_v11 = vld [vmem:[%s1221_s3 + $0x60] sm:$0xff]  ;;  %v230_v12 = vld [vmem:[%s1221_s3 + $0x68] sm:$0xff] }
   0xc   :  { %410 = vst [vmem:[%s1222_s4 + $0x8] sm:$0xff] %v346_v40  ;;  %v349_v52 = vmax.f32 %v285_v42, 0.0  ;;  %v351_v58 = vmax.f32 %v287_v47, 0.0  ;;  %v161_v60 = vadd.f32 %v515_v2, %v93_v49  ;;  %v97_v5 = vmul.f32 %v510_v1, %v29_v50  ;;  %v231_v18 = vld [vmem:[%s1221_s3 + $0x70] sm:$0xff]  ;;  %v33_v19 = vld [vmem:[%s1218_s0 + $0x80] sm:$0xff]  ;;  %v34_v24 = vld [vmem:[%s1218_s0 + $0x88] sm:$0xff] }
   0xd   :  { %411 = vst [vmem:[%s1222_s4 + $0x10] sm:$0xff] %v347_v41  ;;  %v162_v0 = vadd.f32 %v515_v2, %v94_v55  ;;  %v163_v3 = vadd.f32 %v515_v2, %v95_v56  ;;  %v98_v6 = vmul.f32 %v510_v1, %v30_v51  ;;  %v352_v8 = vmax.f32 %v288_v59, 0.0  ;;  %v35_v25 = vld [vmem:[%s1218_s0 + $0x90] sm:$0xff]  ;;  %v232_v30 = vld [vmem:[%s1221_s3 + $0x78] sm:$0xff]  ;;  %v37_v36 = vld [vmem:[%s1218_s0 + $0xa0] sm:$0xff] }
   0xe   :  { %412 = vst [vmem:[%s1222_s4 + $0x18] sm:$0xff] %v348_v46  ;;  %v289_v9 = vadd.f32 %v225_v54, %v161_v60  ;;  %v164_v10 = vadd.f32 %v515_v2, %v96_v63  ;;  %v99_v13 = vmul.f32 %v510_v1, %v31_v57  ;;  %v165_v16 = vadd.f32 %v515_v2, %v97_v5  ;;  %v36_v31 = vld [vmem:[%s1218_s0 + $0x98] sm:$0xff]  ;;  %v38_v37 = vld [vmem:[%s1218_s0 + $0xa8] sm:$0xff]  ;;  %v233_v40 = vld [vmem:[%s1221_s3 + $0x80] sm:$0xff] }
   0xf   :  { %413 = vst [vmem:[%s1222_s4 + $0x20] sm:$0xff] %v349_v52  ;;  %v290_v14 = vadd.f32 %v226_v61, %v162_v0  ;;  %v291_v15 = vadd.f32 %v227_v62, %v163_v3  ;;  %v166_v17 = vadd.f32 %v515_v2, %v98_v6  ;;  %v100_v23 = vmul.f32 %v510_v1, %v32_v7  ;;  %v39_v43 = vld [vmem:[%s1218_s0 + $0xb0] sm:$0xff]  ;;  %v234_v47 = vld [vmem:[%s1221_s3 + $0x88] sm:$0xff]  ;;  %v236_v52 = vld [vmem:[%s1221_s3 + $0x98] sm:$0xff] }
  0x10   :  { %414 = vst [vmem:[%s1222_s4 + $0x28] sm:$0xff] %v350_v53  ;;  %v353_v20 = vmax.f32 %v289_v9, 0.0  ;;  %v292_v21 = vadd.f32 %v228_v4, %v164_v10  ;;  %v167_v22 = vadd.f32 %v515_v2, %v99_v13  ;;  %v293_v28 = vadd.f32 %v229_v11, %v165_v16  ;;  %v235_v48 = vld [vmem:[%s1221_s3 + $0x90] sm:$0xff]  ;;  %v40_v55 = vld [vmem:[%s1218_s0 + $0xb8] sm:$0xff]  ;;  %v237_v59 = vld [vmem:[%s1221_s3 + $0xa0] sm:$0xff] }
  0x11   :  { %415 = vst [vmem:[%s1222_s4 + $0x30] sm:$0xff] %v351_v58  ;;  %v354_v26 = vmax.f32 %v290_v14, 0.0  ;;  %v355_v27 = vmax.f32 %v291_v15, 0.0  ;;  %v294_v29 = vadd.f32 %v230_v12, %v166_v17  ;;  %v168_v34 = vadd.f32 %v515_v2, %v100_v23  ;;  %v238_v60 = vld [vmem:[%s1221_s3 + $0xa8] sm:$0xff]  ;;  %v239_v4 = vld [vmem:[%s1221_s3 + $0xb0] sm:$0xff]  ;;  %v41_v5 = vld [vmem:[%s1218_s0 + $0xc0] sm:$0xff] }
  0x12   :  { %416 = vst [vmem:[%s1222_s4 + $0x38] sm:$0xff] %v352_v8  ;;  %v356_v32 = vmax.f32 %v292_v21, 0.0  ;;  %v295_v33 = vadd.f32 %v231_v18, %v167_v22  ;;  %v101_v35 = vmul.f32 %v510_v1, %v33_v19  ;;  %v357_v38 = vmax.f32 %v293_v28, 0.0  ;;  %v42_v10 = vld [vmem:[%s1218_s0 + $0xc8] sm:$0xff]  ;;  %v43_v11 = vld [vmem:[%s1218_s0 + $0xd0] sm:$0xff]  ;;  %v240_v16 = vld [vmem:[%s1221_s3 + $0xb8] sm:$0xff] }
  0x13   :  { %417 = vst [vmem:[%s1222_s4 + $0x40] sm:$0xff] %v353_v20  ;;  %v358_v39 = vmax.f32 %v294_v29, 0.0  ;;  %v102_v41 = vmul.f32 %v510_v1, %v34_v24  ;;  %v103_v42 = vmul.f32 %v510_v1, %v35_v25  ;;  %v296_v45 = vadd.f32 %v232_v30, %v168_v34  ;;  %v44_v17 = vld [vmem:[%s1218_s0 + $0xd8] sm:$0xff]  ;;  %v45_v22 = vld [vmem:[%s1218_s0 + $0xe0] sm:$0xff]  ;;  %v46_v23 = vld [vmem:[%s1218_s0 + $0xe8] sm:$0xff] }
  0x14   :  { %418 = vst [vmem:[%s1222_s4 + $0x48] sm:$0xff] %v354_v26  ;;  %v359_v44 = vmax.f32 %v295_v33, 0.0  ;;  %v169_v46 = vadd.f32 %v515_v2, %v101_v35  ;;  %v104_v49 = vmul.f32 %v510_v1, %v36_v31  ;;  %v105_v53 = vmul.f32 %v510_v1, %v37_v36  ;;  %v241_v26 = vld [vmem:[%s1221_s3 + $0xc0] sm:$0xff]  ;;  %v47_v29 = vld [vmem:[%s1218_s0 + $0xf0] sm:$0xff]  ;;  %v242_v33 = vld [vmem:[%s1221_s3 + $0xc8] sm:$0xff] }
  0x15   :  { %419 = vst [vmem:[%s1222_s4 + $0x50] sm:$0xff] %v355_v27  ;;  %v170_v50 = vadd.f32 %v515_v2, %v102_v41  ;;  %v171_v51 = vadd.f32 %v515_v2, %v103_v42  ;;  %v106_v54 = vmul.f32 %v510_v1, %v38_v37  ;;  %v360_v56 = vmax.f32 %v296_v45, 0.0  ;;  %v243_v34 = vld [vmem:[%s1221_s3 + $0xd0] sm:$0xff]  ;;  %v48_v41 = vld [vmem:[%s1218_s0 + $0xf8] sm:$0xff]  ;;  %v245_v45 = vld [vmem:[%s1221_s3 + $0xe0] sm:$0xff] }
  0x16   :  { %420 = vst [vmem:[%s1222_s4 + $0x58] sm:$0xff] %v356_v32  ;;  %v297_v57 = vadd.f32 %v233_v40, %v169_v46  ;;  %v172_v58 = vadd.f32 %v515_v2, %v104_v49  ;;  %v107_v61 = vmul.f32 %v510_v1, %v39_v43  ;;  %v173_v0 = vadd.f32 %v515_v2, %v105_v53  ;;  %v246_v46 = vld [vmem:[%s1221_s3 + $0xe8] sm:$0xff]  ;;  %v49_v53 = vld [vmem:[%s1218_s0 + $0x100] sm:$0xff] }
  0x17   :  { %421 = vst [vmem:[%s1222_s4 + $0x60] sm:$0xff] %v357_v38  ;;  %v298_v62 = vadd.f32 %v234_v47, %v170_v50  ;;  %v299_v63 = vadd.f32 %v235_v48, %v171_v51  ;;  %v174_v3 = vadd.f32 %v515_v2, %v106_v54  ;;  %v108_v9 = vmul.f32 %v510_v1, %v40_v55  ;;  %v244_v38 = vld [vmem:[%s1221_s3 + $0xd8] sm:$0xff] }
  0x18   :  { %422 = vst [vmem:[%s1222_s4 + $0x68] sm:$0xff] %v358_v39  ;;  %v361_v6 = vmax.f32 %v297_v57, 0.0  ;;  %v300_v7 = vadd.f32 %v236_v52, %v172_v58  ;;  %v175_v8 = vadd.f32 %v515_v2, %v107_v61  ;;  %v301_v14 = vadd.f32 %v237_v59, %v173_v0  ;;  %v247_v52 = vld [vmem:[%s1221_s3 + $0xf0] sm:$0xff]  ;;  %v50_v58 = vld [vmem:[%s1218_s0 + $0x108] sm:$0xff]  ;;  %v248_v0 = vld [vmem:[%s1221_s3 + $0xf8] sm:$0xff] }
  0x19   :  { %423 = vst [vmem:[%s1222_s4 + $0x70] sm:$0xff] %v359_v44  ;;  %v362_v12 = vmax.f32 %v298_v62, 0.0  ;;  %v363_v13 = vmax.f32 %v299_v63, 0.0  ;;  %v302_v15 = vadd.f32 %v238_v60, %v174_v3  ;;  %v176_v20 = vadd.f32 %v515_v2, %v108_v9  ;;  %v51_v59 = vld [vmem:[%s1218_s0 + $0x110] sm:$0xff]  ;;  %v52_v3 = vld [vmem:[%s1218_s0 + $0x118] sm:$0xff]  ;;  %v54_v9 = vld [vmem:[%s1218_s0 + $0x128] sm:$0xff] }
  0x1a   :  { %424 = vst [vmem:[%s1222_s4 + $0x78] sm:$0xff] %v360_v56  ;;  %v364_v18 = vmax.f32 %v300_v7, 0.0  ;;  %v303_v19 = vadd.f32 %v239_v4, %v175_v8  ;;  %v109_v21 = vmul.f32 %v510_v1, %v41_v5  ;;  %v365_v24 = vmax.f32 %v301_v14, 0.0  ;;  %v53_v8 = vld [vmem:[%s1218_s0 + $0x120] sm:$0xff] }
  0x1b   :  { %425 = vst [vmem:[%s1222_s4 + $0x80] sm:$0xff] %v361_v6  ;;  %v366_v25 = vmax.f32 %v302_v15, 0.0  ;;  %v110_v27 = vmul.f32 %v510_v1, %v42_v10  ;;  %v111_v28 = vmul.f32 %v510_v1, %v43_v11  ;;  %v304_v31 = vadd.f32 %v240_v16, %v176_v20  ;;  %v55_v15 = vld [vmem:[%s1218_s0 + $0x130] sm:$0xff] }
  0x1c   :  { %426 = vst [vmem:[%s1222_s4 + $0x88] sm:$0xff] %v362_v12  ;;  %v367_v30 = vmax.f32 %v303_v19, 0.0  ;;  %v177_v32 = vadd.f32 %v515_v2, %v109_v21  ;;  %v112_v35 = vmul.f32 %v510_v1, %v44_v17  ;;  %v113_v39 = vmul.f32 %v510_v1, %v45_v22  ;;  %v249_v12 = vld [vmem:[%s1221_s3 + $0x100] sm:$0xff]  ;;  %v250_v19 = vld [vmem:[%s1221_s3 + $0x108] sm:$0xff]  ;;  %v251_v20 = vld [vmem:[%s1221_s3 + $0x110] sm:$0xff] }
  0x1d   :  { %427 = vst [vmem:[%s1222_s4 + $0x90] sm:$0xff] %v363_v13  ;;  %v178_v36 = vadd.f32 %v515_v2, %v110_v27  ;;  %v179_v37 = vadd.f32 %v515_v2, %v111_v28  ;;  %v114_v40 = vmul.f32 %v510_v1, %v46_v23  ;;  %v368_v42 = vmax.f32 %v304_v31, 0.0  ;;  %v56_v27 = vld [vmem:[%s1218_s0 + $0x138] sm:$0xff]  ;;  %v253_v31 = vld [vmem:[%s1221_s3 + $0x120] sm:$0xff] }
  0x1e   :  { %428 = vst [vmem:[%s1222_s4 + $0x98] sm:$0xff] %v364_v18  ;;  %v305_v43 = vadd.f32 %v241_v26, %v177_v32  ;;  %v180_v44 = vadd.f32 %v515_v2, %v112_v35  ;;  %v115_v47 = vmul.f32 %v510_v1, %v47_v29  ;;  %v181_v50 = vadd.f32 %v515_v2, %v113_v39  ;;  %v254_v32 = vld [vmem:[%s1221_s3 + $0x128] sm:$0xff]  ;;  %v57_v39 = vld [vmem:[%s1218_s0 + $0x140] sm:$0xff] }
  0x1f   :  { %429 = vst [vmem:[%s1222_s4 + $0xa0] sm:$0xff] %v365_v24  ;;  %v306_v48 = vadd.f32 %v242_v33, %v178_v36  ;;  %v307_v49 = vadd.f32 %v243_v34, %v179_v37  ;;  %v182_v51 = vadd.f32 %v515_v2, %v114_v40  ;;  %v116_v57 = vmul.f32 %v510_v1, %v48_v41  ;;  %v252_v24 = vld [vmem:[%s1221_s3 + $0x118] sm:$0xff] }
  0x20   :  { %430 = vst [vmem:[%s1222_s4 + $0xa8] sm:$0xff] %v366_v25  ;;  %v369_v54 = vmax.f32 %v305_v43, 0.0  ;;  %v308_v55 = vadd.f32 %v244_v38, %v180_v44  ;;  %v183_v56 = vadd.f32 %v515_v2, %v115_v47  ;;  %v309_v62 = vadd.f32 %v245_v45, %v181_v50  ;;  %v255_v38 = vld [vmem:[%s1221_s3 + $0x130] sm:$0xff]  ;;  %v58_v44 = vld [vmem:[%s1218_s0 + $0x148] sm:$0xff]  ;;  %v256_v50 = vld [vmem:[%s1221_s3 + $0x138] sm:$0xff] }
  0x21   :  { %431 = vst [vmem:[%s1222_s4 + $0xb0] sm:$0xff] %v367_v30  ;;  %v370_v60 = vmax.f32 %v306_v48, 0.0  ;;  %v371_v61 = vmax.f32 %v307_v49, 0.0  ;;  %v310_v63 = vadd.f32 %v246_v46, %v182_v51  ;;  %v184_v6 = vadd.f32 %v515_v2, %v116_v57  ;;  %v59_v45 = vld [vmem:[%s1218_s0 + $0x150] sm:$0xff]  ;;  %v60_v51 = vld [vmem:[%s1218_s0 + $0x158] sm:$0xff]  ;;  %v62_v57 = vld [vmem:[%s1218_s0 + $0x168] sm:$0xff] }
  0x22   :  { %432 = vst [vmem:[%s1222_s4 + $0xb8] sm:$0xff] %v368_v42  ;;  %v372_v4 = vmax.f32 %v308_v55, 0.0  ;;  %v311_v5 = vadd.f32 %v247_v52, %v183_v56  ;;  %v117_v7 = vmul.f32 %v510_v1, %v49_v53  ;;  %v373_v10 = vmax.f32 %v309_v62, 0.0  ;;  %v61_v56 = vld [vmem:[%s1218_s0 + $0x160] sm:$0xff] }
  0x23   :  { %433 = vst [vmem:[%s1222_s4 + $0xc0] sm:$0xff] %v369_v54  ;;  %v374_v11 = vmax.f32 %v310_v63, 0.0  ;;  %v118_v13 = vmul.f32 %v510_v1, %v50_v58  ;;  %v119_v14 = vmul.f32 %v510_v1, %v51_v59  ;;  %v312_v17 = vadd.f32 %v248_v0, %v184_v6  ;;  %v63_v63 = vld [vmem:[%s1218_s0 + $0x170] sm:$0xff] }
  0x24   :  { %434 = vst [vmem:[%s1222_s4 + $0xc8] sm:$0xff] %v370_v60  ;;  %v375_v16 = vmax.f32 %v311_v5, 0.0  ;;  %v185_v18 = vadd.f32 %v515_v2, %v117_v7  ;;  %v120_v21 = vmul.f32 %v510_v1, %v52_v3  ;;  %v121_v25 = vmul.f32 %v510_v1, %v53_v8  ;;  %v257_v60 = vld [vmem:[%s1221_s3 + $0x140] sm:$0xff]  ;;  %v258_v5 = vld [vmem:[%s1221_s3 + $0x148] sm:$0xff]  ;;  %v259_v6 = vld [vmem:[%s1221_s3 + $0x150] sm:$0xff] }
  0x25   :  { %435 = vst [vmem:[%s1222_s4 + $0xd0] sm:$0xff] %v371_v61  ;;  %v186_v22 = vadd.f32 %v515_v2, %v118_v13  ;;  %v187_v23 = vadd.f32 %v515_v2, %v119_v14  ;;  %v122_v26 = vmul.f32 %v510_v1, %v54_v9  ;;  %v376_v28 = vmax.f32 %v312_v17, 0.0  ;;  %v64_v13 = vld [vmem:[%s1218_s0 + $0x178] sm:$0xff]  ;;  %v261_v17 = vld [vmem:[%s1221_s3 + $0x160] sm:$0xff] }
  0x26   :  { %436 = vst [vmem:[%s1222_s4 + $0xd8] sm:$0xff] %v372_v4  ;;  %v313_v29 = vadd.f32 %v249_v12, %v185_v18  ;;  %v188_v30 = vadd.f32 %v515_v2, %v120_v21  ;;  %v123_v33 = vmul.f32 %v510_v1, %v55_v15  ;;  %v189_v36 = vadd.f32 %v515_v2, %v121_v25  ;;  %v262_v18 = vld [vmem:[%s1221_s3 + $0x168] sm:$0xff]  ;;  %v65_v25 = vld [vmem:[%s1218_s0 + $0x180] sm:$0xff] }
  0x27   :  { %437 = vst [vmem:[%s1222_s4 + $0xe0] sm:$0xff] %v373_v10  ;;  %v314_v34 = vadd.f32 %v250_v19, %v186_v22  ;;  %v315_v35 = vadd.f32 %v251_v20, %v187_v23  ;;  %v190_v37 = vadd.f32 %v515_v2, %v122_v26  ;;  %v124_v43 = vmul.f32 %v510_v1, %v56_v27  ;;  %v260_v10 = vld [vmem:[%s1221_s3 + $0x158] sm:$0xff] }
  0x28   :  { %438 = vst [vmem:[%s1222_s4 + $0xe8] sm:$0xff] %v374_v11  ;;  %v377_v40 = vmax.f32 %v313_v29, 0.0  ;;  %v316_v41 = vadd.f32 %v252_v24, %v188_v30  ;;  %v191_v42 = vadd.f32 %v515_v2, %v123_v33  ;;  %v317_v48 = vadd.f32 %v253_v31, %v189_v36  ;;  %v263_v24 = vld [vmem:[%s1221_s3 + $0x170] sm:$0xff]  ;;  %v66_v30 = vld [vmem:[%s1218_s0 + $0x188] sm:$0xff]  ;;  %v264_v36 = vld [vmem:[%s1221_s3 + $0x178] sm:$0xff] }
  0x29   :  { %439 = vst [vmem:[%s1222_s4 + $0xf0] sm:$0xff] %v375_v16  ;;  %v378_v46 = vmax.f32 %v314_v34, 0.0  ;;  %v379_v47 = vmax.f32 %v315_v35, 0.0  ;;  %v318_v49 = vadd.f32 %v254_v32, %v190_v37  ;;  %v192_v54 = vadd.f32 %v515_v2, %v124_v43  ;;  %v67_v31 = vld [vmem:[%s1218_s0 + $0x190] sm:$0xff]  ;;  %v68_v37 = vld [vmem:[%s1218_s0 + $0x198] sm:$0xff]  ;;  %v70_v43 = vld [vmem:[%s1218_s0 + $0x1a8] sm:$0xff] }
  0x2a   :  { %440 = vst [vmem:[%s1222_s4 + $0xf8] sm:$0xff] %v376_v28  ;;  %v380_v52 = vmax.f32 %v316_v41, 0.0  ;;  %v319_v53 = vadd.f32 %v255_v38, %v191_v42  ;;  %v125_v55 = vmul.f32 %v510_v1, %v57_v39  ;;  %v381_v58 = vmax.f32 %v317_v48, 0.0  ;;  %v69_v42 = vld [vmem:[%s1218_s0 + $0x1a0] sm:$0xff] }
  0x2b   :  { %441 = vst [vmem:[%s1222_s4 + $0x100] sm:$0xff] %v377_v40  ;;  %v382_v59 = vmax.f32 %v318_v49, 0.0  ;;  %v126_v61 = vmul.f32 %v510_v1, %v58_v44  ;;  %v127_v62 = vmul.f32 %v510_v1, %v59_v45  ;;  %v320_v3 = vadd.f32 %v256_v50, %v192_v54  ;;  %v71_v49 = vld [vmem:[%s1218_s0 + $0x1b0] sm:$0xff] }
  0x2c   :  { %442 = vst [vmem:[%s1222_s4 + $0x108] sm:$0xff] %v378_v46  ;;  %v383_v0 = vmax.f32 %v319_v53, 0.0  ;;  %v193_v4 = vadd.f32 %v515_v2, %v125_v55  ;;  %v128_v7 = vmul.f32 %v510_v1, %v60_v51  ;;  %v129_v11 = vmul.f32 %v510_v1, %v61_v56  ;;  %v265_v46 = vld [vmem:[%s1221_s3 + $0x180] sm:$0xff]  ;;  %v266_v53 = vld [vmem:[%s1221_s3 + $0x188] sm:$0xff]  ;;  %v267_v54 = vld [vmem:[%s1221_s3 + $0x190] sm:$0xff] }
  0x2d   :  { %443 = vst [vmem:[%s1222_s4 + $0x110] sm:$0xff] %v379_v47  ;;  %v194_v8 = vadd.f32 %v515_v2, %v126_v61  ;;  %v195_v9 = vadd.f32 %v515_v2, %v127_v62  ;;  %v130_v12 = vmul.f32 %v510_v1, %v62_v57  ;;  %v384_v14 = vmax.f32 %v320_v3, 0.0  ;;  %v72_v61 = vld [vmem:[%s1218_s0 + $0x1b8] sm:$0xff]  ;;  %v269_v3 = vld [vmem:[%s1221_s3 + $0x1a0] sm:$0xff] }
  0x2e   :  { %444 = vst [vmem:[%s1222_s4 + $0x118] sm:$0xff] %v380_v52  ;;  %v321_v15 = vadd.f32 %v257_v60, %v193_v4  ;;  %v196_v16 = vadd.f32 %v515_v2, %v128_v7  ;;  %v131_v19 = vmul.f32 %v510_v1, %v63_v63  ;;  %v197_v22 = vadd.f32 %v515_v2, %v129_v11  ;;  %v270_v4 = vld [vmem:[%s1221_s3 + $0x1a8] sm:$0xff]  ;;  %v73_v11 = vld [vmem:[%s1218_s0 + $0x1c0] sm:$0xff] }
  0x2f   :  { %445 = vst [vmem:[%s1222_s4 + $0x120] sm:$0xff] %v381_v58  ;;  %v322_v20 = vadd.f32 %v258_v5, %v194_v8  ;;  %v323_v21 = vadd.f32 %v259_v6, %v195_v9  ;;  %v198_v23 = vadd.f32 %v515_v2, %v130_v12  ;;  %v132_v29 = vmul.f32 %v510_v1, %v64_v13  ;;  %v268_v58 = vld [vmem:[%s1221_s3 + $0x198] sm:$0xff] }
  0x30   :  { %446 = vst [vmem:[%s1222_s4 + $0x128] sm:$0xff] %v382_v59  ;;  %v385_v26 = vmax.f32 %v321_v15, 0.0  ;;  %v324_v27 = vadd.f32 %v260_v10, %v196_v16  ;;  %v199_v28 = vadd.f32 %v515_v2, %v131_v19  ;;  %v325_v34 = vadd.f32 %v261_v17, %v197_v22  ;;  %v271_v10 = vld [vmem:[%s1221_s3 + $0x1b0] sm:$0xff]  ;;  %v74_v16 = vld [vmem:[%s1218_s0 + $0x1c8] sm:$0xff]  ;;  %v272_v22 = vld [vmem:[%s1221_s3 + $0x1b8] sm:$0xff] }
  0x31   :  { %447 = vst [vmem:[%s1222_s4 + $0x130] sm:$0xff] %v383_v0  ;;  %v386_v32 = vmax.f32 %v322_v20, 0.0  ;;  %v387_v33 = vmax.f32 %v323_v21, 0.0  ;;  %v326_v35 = vadd.f32 %v262_v18, %v198_v23  ;;  %v200_v40 = vadd.f32 %v515_v2, %v132_v29  ;;  %v75_v17 = vld [vmem:[%s1218_s0 + $0x1d0] sm:$0xff]  ;;  %v76_v23 = vld [vmem:[%s1218_s0 + $0x1d8] sm:$0xff]  ;;  %v78_v29 = vld [vmem:[%s1218_s0 + $0x1e8] sm:$0xff] }
  0x32   :  { %448 = vst [vmem:[%s1222_s4 + $0x138] sm:$0xff] %v384_v14  ;;  %v388_v38 = vmax.f32 %v324_v27, 0.0  ;;  %v327_v39 = vadd.f32 %v263_v24, %v199_v28  ;;  %v133_v41 = vmul.f32 %v510_v1, %v65_v25  ;;  %v389_v44 = vmax.f32 %v325_v34, 0.0  ;;  %v77_v28 = vld [vmem:[%s1218_s0 + $0x1e0] sm:$0xff] }
  0x33   :  { %449 = vst [vmem:[%s1222_s4 + $0x140] sm:$0xff] %v385_v26  ;;  %v390_v45 = vmax.f32 %v326_v35, 0.0  ;;  %v134_v47 = vmul.f32 %v510_v1, %v66_v30  ;;  %v135_v48 = vmul.f32 %v510_v1, %v67_v31  ;;  %v328_v51 = vadd.f32 %v264_v36, %v200_v40  ;;  %v79_v35 = vld [vmem:[%s1218_s0 + $0x1f0] sm:$0xff] }
  0x34   :  { %450 = vst [vmem:[%s1222_s4 + $0x148] sm:$0xff] %v386_v32  ;;  %v391_v50 = vmax.f32 %v327_v39, 0.0  ;;  %v201_v52 = vadd.f32 %v515_v2, %v133_v41  ;;  %v136_v55 = vmul.f32 %v510_v1, %v68_v37  ;;  %v137_v59 = vmul.f32 %v510_v1, %v69_v42  ;;  %v273_v32 = vld [vmem:[%s1221_s3 + $0x1c0] sm:$0xff]  ;;  %v274_v39 = vld [vmem:[%s1221_s3 + $0x1c8] sm:$0xff]  ;;  %v275_v40 = vld [vmem:[%s1221_s3 + $0x1d0] sm:$0xff] }
  0x35   :  { %451 = vst [vmem:[%s1222_s4 + $0x150] sm:$0xff] %v387_v33  ;;  %v202_v56 = vadd.f32 %v515_v2, %v134_v47  ;;  %v203_v57 = vadd.f32 %v515_v2, %v135_v48  ;;  %v138_v60 = vmul.f32 %v510_v1, %v70_v43  ;;  %v392_v62 = vmax.f32 %v328_v51, 0.0  ;;  %v80_v47 = vld [vmem:[%s1218_s0 + $0x1f8] sm:$0xff]  ;;  %v277_v51 = vld [vmem:[%s1221_s3 + $0x1e0] sm:$0xff] }
  0x36   :  { %452 = vst [vmem:[%s1222_s4 + $0x158] sm:$0xff] %v388_v38  ;;  %v329_v63 = vadd.f32 %v265_v46, %v201_v52  ;;  %v204_v0 = vadd.f32 %v515_v2, %v136_v55  ;;  %v139_v5 = vmul.f32 %v510_v1, %v71_v49  ;;  %v205_v8 = vadd.f32 %v515_v2, %v137_v59  ;;  %v278_v52 = vld [vmem:[%s1221_s3 + $0x1e8] sm:$0xff] }
  0x37   :  { %453 = vst [vmem:[%s1222_s4 + $0x160] sm:$0xff] %v389_v44  ;;  %v330_v6 = vadd.f32 %v266_v53, %v202_v56  ;;  %v331_v7 = vadd.f32 %v267_v54, %v203_v57  ;;  %v206_v9 = vadd.f32 %v515_v2, %v138_v60  ;;  %v140_v15 = vmul.f32 %v510_v1, %v72_v61  ;;  %v276_v44 = vld [vmem:[%s1221_s3 + $0x1d8] sm:$0xff] }
  0x38   :  { %454 = vst [vmem:[%s1222_s4 + $0x168] sm:$0xff] %v390_v45  ;;  %v393_v12 = vmax.f32 %v329_v63, 0.0  ;;  %v332_v13 = vadd.f32 %v268_v58, %v204_v0  ;;  %v207_v14 = vadd.f32 %v515_v2, %v139_v5  ;;  %v333_v20 = vadd.f32 %v269_v3, %v205_v8  ;;  %v279_v58 = vld [vmem:[%s1221_s3 + $0x1f0] sm:$0xff]  ;;  %v280_v5 = vld [vmem:[%s1221_s3 + $0x1f8] sm:$0xff] }
  0x39   :  { %455 = vst [vmem:[%s1222_s4 + $0x170] sm:$0xff] %v391_v50  ;;  %v394_v18 = vmax.f32 %v330_v6, 0.0  ;;  %v395_v19 = vmax.f32 %v331_v7, 0.0  ;;  %v334_v21 = vadd.f32 %v270_v4, %v206_v9  ;;  %v208_v26 = vadd.f32 %v515_v2, %v140_v15 }
  0x3a   :  { %456 = vst [vmem:[%s1222_s4 + $0x178] sm:$0xff] %v392_v62  ;;  %v396_v24 = vmax.f32 %v332_v13, 0.0  ;;  %v335_v25 = vadd.f32 %v271_v10, %v207_v14  ;;  %v141_v27 = vmul.f32 %v510_v1, %v73_v11  ;;  %v397_v30 = vmax.f32 %v333_v20, 0.0 }
  0x3b   :  { %457 = vst [vmem:[%s1222_s4 + $0x180] sm:$0xff] %v393_v12  ;;  %v398_v31 = vmax.f32 %v334_v21, 0.0  ;;  %v142_v33 = vmul.f32 %v510_v1, %v74_v16  ;;  %v143_v34 = vmul.f32 %v510_v1, %v75_v17  ;;  %v336_v37 = vadd.f32 %v272_v22, %v208_v26 }
  0x3c   :  { %458 = vst [vmem:[%s1222_s4 + $0x188] sm:$0xff] %v394_v18  ;;  %v399_v36 = vmax.f32 %v335_v25, 0.0  ;;  %v209_v38 = vadd.f32 %v515_v2, %v141_v27  ;;  %v144_v41 = vmul.f32 %v510_v1, %v76_v23  ;;  %v145_v45 = vmul.f32 %v510_v1, %v77_v28 }
  0x3d   :  { %459 = vst [vmem:[%s1222_s4 + $0x190] sm:$0xff] %v395_v19  ;;  %v210_v42 = vadd.f32 %v515_v2, %v142_v33  ;;  %v211_v43 = vadd.f32 %v515_v2, %v143_v34  ;;  %v146_v46 = vmul.f32 %v510_v1, %v78_v29  ;;  %v400_v48 = vmax.f32 %v336_v37, 0.0 }
  0x3e   :  { %460 = vst [vmem:[%s1222_s4 + $0x198] sm:$0xff] %v396_v24  ;;  %v337_v49 = vadd.f32 %v273_v32, %v209_v38  ;;  %v212_v50 = vadd.f32 %v515_v2, %v144_v41  ;;  %v147_v53 = vmul.f32 %v510_v1, %v79_v35  ;;  %v213_v56 = vadd.f32 %v515_v2, %v145_v45 }
  0x3f   :  { %461 = vst [vmem:[%s1222_s4 + $0x1a0] sm:$0xff] %v397_v30  ;;  %v338_v54 = vadd.f32 %v274_v39, %v210_v42  ;;  %v339_v55 = vadd.f32 %v275_v40, %v211_v43  ;;  %v214_v57 = vadd.f32 %v515_v2, %v146_v46  ;;  %v148_v62 = vmul.f32 %v510_v1, %v80_v47 }
  0x40   :  { %462 = vst [vmem:[%s1222_s4 + $0x1a8] sm:$0xff] %v398_v31  ;;  %v401_v59 = vmax.f32 %v337_v49, 0.0  ;;  %v340_v60 = vadd.f32 %v276_v44, %v212_v50  ;;  %v215_v61 = vadd.f32 %v515_v2, %v147_v53  ;;  %v341_v3 = vadd.f32 %v277_v51, %v213_v56 }
  0x41   :  { %463 = vst [vmem:[%s1222_s4 + $0x1b0] sm:$0xff] %v399_v36  ;;  %v402_v63 = vmax.f32 %v338_v54, 0.0  ;;  %v403_v0 = vmax.f32 %v339_v55, 0.0  ;;  %v342_v4 = vadd.f32 %v278_v52, %v214_v57  ;;  %v216_v1 = vadd.f32 %v515_v2, %v148_v62 }
  0x42   :  { %464 = vst [vmem:[%s1222_s4 + $0x1b8] sm:$0xff] %v400_v48  ;;  %v404_v6 = vmax.f32 %v340_v60, 0.0  ;;  %v343_v7 = vadd.f32 %v279_v58, %v215_v61  ;;  %v405_v8 = vmax.f32 %v341_v3, 0.0 }
  0x43   :  { %465 = vst [vmem:[%s1222_s4 + $0x1c0] sm:$0xff] %v401_v59  ;;  %v406_v9 = vmax.f32 %v342_v4, 0.0  ;;  %v344_v11 = vadd.f32 %v280_v5, %v216_v1 }
  0x44   :  { %466 = vst [vmem:[%s1222_s4 + $0x1c8] sm:$0xff] %v402_v63  ;;  %v407_v10 = vmax.f32 %v343_v7, 0.0 }
  0x45   :  { %467 = vst [vmem:[%s1222_s4 + $0x1d0] sm:$0xff] %v403_v0  ;;  %v408_v2 = vmax.f32 %v344_v11, 0.0 }
  0x46   :  { %468 = vst [vmem:[%s1222_s4 + $0x1d8] sm:$0xff] %v404_v6 }
  0x47   :  { %469 = vst [vmem:[%s1222_s4 + $0x1e0] sm:$0xff] %v405_v8 }
  0x48   :  { %470 = vst [vmem:[%s1222_s4 + $0x1e8] sm:$0xff] %v406_v9 }
  0x49   :  { %471 = vst [vmem:[%s1222_s4 + $0x1f0] sm:$0xff] %v407_v10 }
  0x4a   :  { %472 = vst [vmem:[%s1222_s4 + $0x1f8] sm:$0xff] %v408_v2 }

</bundles_post_ra>
